<compile_context>
chip_gen: v7x
topology: tpu7x:2x2x1
jax: 0.10.0
libtpu: 0.0.40
codegen_flags: <defaults>
</compile_context>

<pallas_src>
import jax
import jax.numpy as jnp
from jax import lax
from jax.experimental import pallas as pl
from jax.experimental.pallas import tpu as pltpu


# ---------------------------------------------------------------------------
# Fused kernel: wavefronted LSTM stack + head, whole problem VMEM resident
# ---------------------------------------------------------------------------
def _make_fused_kernel(num_layers):
    """Builds the fused kernel for a fixed (static) number of LSTM layers."""

    def kernel(*refs):
        # inputs : x(T,B,D) f32,
        #          [wih_t(Din,4H) bf16, whh_t(H,4H) bf16, b(1,4H) f32] * L,
        #          wc_t(H,H) bf16, bc(1,H), gamma(1,H), beta(1,H),
        #          wfc_t(H,NPAD) bf16, bfc(1,NPAD)
        # output : out(B, NPAD) f32
        x_ref = refs[0]
        layer_refs = refs[1:1 + 3 * num_layers]
        (wc_t_ref, bc_ref, gamma_ref, beta_ref,
         wfc_t_ref, bfc_ref) = refs[1 + 3 * num_layers:7 + 3 * num_layers]
        out_ref = refs[7 + 3 * num_layers]

        T, B, D = x_ref.shape
        L = num_layers
        H = layer_refs[1].shape[0]                      # whh_t: (H, 4H)

        # Loop-invariant weight loads, hoisted once.
        wih_t = [layer_refs[3 * l][...] for l in range(L)]       # bf16
        whh_t = [layer_refs[3 * l + 1][...] for l in range(L)]   # bf16
        bias = [layer_refs[3 * l + 2][...] for l in range(L)]    # f32 (b_ih+b_hh)

        # ------------------------------------------------------------------
        # Layer-0 input projection hoisted over the whole sequence (it only
        # depends on x, so it is off the serial chain), then reshaped so the
        # per-step access is a clean leading-axis tile index.
        # ------------------------------------------------------------------
        x_flat = x_ref[...].reshape(T * B, D)
        gx0 = (jnp.dot(x_flat.astype(jnp.bfloat16), wih_t[0],
                       preferred_element_type=jnp.float32)
               + bias[0]).reshape(T, B, 4 * H)                   # (T, B, 4H) f32

        def cell(pre, h_prev, c_prev, whh, first):
            """One LSTM cell step. `pre` already contains x-projection + bias."""
            if first:
                gates = pre                               # h0 = 0 -> skip matmul
            else:
                gates = pre + jnp.dot(h_prev.astype(jnp.bfloat16), whh,
                                      preferred_element_type=jnp.float32)
            # Lane-dense sigmoid on the packed (B, 4H) gates; tanh only on the
            # g quarter (PyTorch gate order: i, f, g, o).
            sig = jax.nn.sigmoid(gates)
            i = sig[:, 0 * H:1 * H]
            f = sig[:, 1 * H:2 * H]
            o = sig[:, 3 * H:4 * H]
            g = jnp.tanh(gates[:, 2 * H:3 * H])
            c_new = i * g if first else f * c_prev + i * g   # c0 = 0
            h_new = o * jnp.tanh(c_new)
            return h_new, c_new

        # ------------------------------------------------------------------
        # Wavefront over (layer, time): (l, t) only depends on (l, t-1) and
        # (l-1, t), so the statically unrolled emission lets the scheduler
        # overlap layer l's step t with layer l-1's step t+1.
        # ------------------------------------------------------------------
        h = [None] * L
        c = [None] * L
        outs = [[] for _ in range(L)]                     # per-layer h_t lists
        for wave in range(T + L - 1):
            for l in range(L):
                t = wave - l
                if t < 0 or t >= T:
                    continue
                if l == 0:
                    pre = gx0[t]
                else:
                    pre = jnp.dot(outs[l - 1][t].astype(jnp.bfloat16), wih_t[l],
                                  preferred_element_type=jnp.float32) + bias[l]
                h[l], c[l] = cell(pre, h[l], c[l], whh_t[l], first=(t == 0))
                outs[l].append(h[l])

        # ------------------------------------------------------------------
        # Head: ReLU -> Conv1d(k=1) -> BatchNorm1d(train stats) -> ReLU
        #       -> mean over time -> Linear, all on aligned (B, H) tiles.
        # ------------------------------------------------------------------
        wc_t = wc_t_ref[...]
        bc = bc_ref[...]
        zs = []
        acc_z = jnp.zeros((B, H), jnp.float32)
        acc_z2 = jnp.zeros((B, H), jnp.float32)
        for t in range(T):
            a_t = jnp.maximum(outs[L - 1][t], 0.0)                     # ReLU
            z_t = jnp.dot(a_t.astype(jnp.bfloat16), wc_t,
                          preferred_element_type=jnp.float32) + bc     # conv k=1
            zs.append(z_t)
            acc_z = acc_z + z_t
            acc_z2 = acc_z2 + z_t * z_t

        # BatchNorm1d training mode: per-channel stats over (batch*time),
        # biased variance, eps = 1e-5.
        inv_n = 1.0 / float(T * B)
        mean = jnp.sum(acc_z, axis=0, keepdims=True) * inv_n           # (1, H)
        var = jnp.sum(acc_z2, axis=0, keepdims=True) * inv_n - mean * mean
        scale = gamma_ref[...] * lax.rsqrt(var + 1e-5)
        shift = beta_ref[...] - mean * scale

        # Normalize + ReLU + AdaptiveAvgPool1d(1) (mean over time).
        pooled = jnp.zeros((B, H), jnp.float32)
        for t in range(T):
            pooled = pooled + jnp.maximum(zs[t] * scale + shift, 0.0)
        pooled = pooled * (1.0 / float(T))                             # (B, H)

        # Final Linear into a lane-dense (128-wide padded) output slab.
        out_ref[...] = (jnp.dot(pooled.astype(jnp.bfloat16), wfc_t_ref[...],
                                preferred_element_type=jnp.float32)
                        + bfc_ref[...])

    return kernel


# ---------------------------------------------------------------------------
# One-time weight prep (hoisted out of the per-call path)
# ---------------------------------------------------------------------------
def prepare_params(params):
    """Transposes, bf16 casts, bias fusion, fc lane padding — run once."""
    lstm = params["lstm"]
    H = lstm[0]["w_hh"].shape[1]
    n_out = params["fc_w"].shape[0]
    n_out_pad = max(128, ((n_out + 127) // 128) * 128)

    layers = []
    for layer in lstm:
        layers.append((
            jnp.transpose(layer["w_ih"]).astype(jnp.bfloat16),            # (Din, 4H)
            jnp.transpose(layer["w_hh"]).astype(jnp.bfloat16),            # (H, 4H)
            (layer["b_ih"] + layer["b_hh"]).reshape(1, 4 * H).astype(jnp.float32),
        ))

    # Conv1d(k=1) weight (H_out, H_in, 1) -> (H_in, H_out) for channels-last matmul.
    wc_t = jnp.transpose(params["conv_w"].reshape(H, H)).astype(jnp.bfloat16)
    # Linear weight (n_out, H) -> (H, n_out), padded to a lane-dense slab.
    wfc_t = jnp.zeros((H, n_out_pad), jnp.bfloat16).at[:, :n_out].set(
        jnp.transpose(params["fc_w"]).astype(jnp.bfloat16))
    bfc = jnp.zeros((1, n_out_pad), jnp.float32).at[0, :n_out].set(params["fc_b"])

    return {
        "layers": layers,
        "wc_t": wc_t,
        "bc": params["conv_b"].reshape(1, H).astype(jnp.float32),
        "gamma": params["bn_gamma"].reshape(1, H).astype(jnp.float32),
        "beta": params["bn_beta"].reshape(1, H).astype(jnp.float32),
        "wfc_t": wfc_t,
        "bfc": bfc,
    }


# ---------------------------------------------------------------------------
# Per-call wrapper: only the x transpose + pallas_call launch
# ---------------------------------------------------------------------------
def rnn_forward(x, prepped, n_out):
    """x: (B, T, in_dim), batch_first like the PyTorch module."""
    B, T, _ = x.shape
    num_layers = len(prepped["layers"])
    n_out_pad = prepped["wfc_t"].shape[1]

    x_tbd = jnp.transpose(x, (1, 0, 2)).astype(jnp.float32)   # time-major (T, B, D)

    args = [x_tbd]
    for (wih_t, whh_t, b) in prepped["layers"]:
        args += [wih_t, whh_t, b]
    args += [prepped["wc_t"], prepped["bc"], prepped["gamma"], prepped["beta"],
             prepped["wfc_t"], prepped["bfc"]]

    vmem = pl.BlockSpec(memory_space=pltpu.MemorySpace.VMEM)
    out_padded = pl.pallas_call(
        _make_fused_kernel(num_layers),
        out_shape=jax.ShapeDtypeStruct((B, n_out_pad), jnp.float32),
        in_specs=[vmem] * len(args),
        out_specs=vmem,
        compiler_params=pltpu.CompilerParams(vmem_limit_bytes=32 * 1024 * 1024),
    )(*args)
    return out_padded[:, :n_out]


# ---------------------------------------------------------------------------
# Parameters (match PyTorch defaults: U(-1/sqrt(H), 1/sqrt(H)) etc.)
# ---------------------------------------------------------------------------
def init_params(key, in_dim, hidden_dim, num_layers, n_out):
    params = {"lstm": []}
    stdv = 1.0 / jnp.sqrt(hidden_dim)
    for layer in range(num_layers):
        d = in_dim if layer == 0 else hidden_dim
        key, k1, k2, k3, k4 = jax.random.split(key, 5)
        params["lstm"].append({
            "w_ih": jax.random.uniform(k1, (4 * hidden_dim, d), jnp.float32, -stdv, stdv),
            "w_hh": jax.random.uniform(k2, (4 * hidden_dim, hidden_dim), jnp.float32, -stdv, stdv),
            "b_ih": jax.random.uniform(k3, (4 * hidden_dim,), jnp.float32, -stdv, stdv),
            "b_hh": jax.random.uniform(k4, (4 * hidden_dim,), jnp.float32, -stdv, stdv),
        })
    key, k1, k2, k3, k4 = jax.random.split(key, 5)
    cstd = 1.0 / jnp.sqrt(hidden_dim)                    # conv fan_in = hidden_dim * 1
    params["conv_w"] = jax.random.uniform(k1, (hidden_dim, hidden_dim, 1), jnp.float32, -cstd, cstd)
    params["conv_b"] = jax.random.uniform(k2, (hidden_dim,), jnp.float32, -cstd, cstd)
    params["bn_gamma"] = jnp.ones((hidden_dim,), jnp.float32)
    params["bn_beta"] = jnp.zeros((hidden_dim,), jnp.float32)
    fstd = 1.0 / jnp.sqrt(hidden_dim)
    params["fc_w"] = jax.random.uniform(k3, (n_out, hidden_dim), jnp.float32, -fstd, fstd)
    params["fc_b"] = jax.random.uniform(k4, (n_out,), jnp.float32, -fstd, fstd)
    return params


if __name__ == "__main__":
    in_dim, hidden_dim, num_layers, n_out = 16, 32, 2, 8
    B, T = 4, 8

    key = jax.random.PRNGKey(0)
    kx, kp = jax.random.split(key)
    x = jax.random.normal(kx, (B, T, in_dim), jnp.float32)
    params = init_params(kp, in_dim, hidden_dim, num_layers, n_out)

    prepped = prepare_params(params)        # one-time weight prep (hoisted)
    fwd = jax.jit(rnn_forward, static_argnums=2)
    logits = fwd(x, prepped, n_out)
    jax.block_until_ready(logits)
    assert logits.shape == (B, n_out)
    print("KERNEL_OK")
</pallas_src>

<mosaic_0001>
module attributes {stable_mosaic.version = 11 : i64} {
  func.func @kernel(%arg0: memref<8x4x16xf32, #tpu.memory_space<vmem>>, %arg1: memref<16x128xbf16, #tpu.memory_space<vmem>>, %arg2: memref<32x128xbf16, #tpu.memory_space<vmem>>, %arg3: memref<1x128xf32, #tpu.memory_space<vmem>>, %arg4: memref<32x128xbf16, #tpu.memory_space<vmem>>, %arg5: memref<32x128xbf16, #tpu.memory_space<vmem>>, %arg6: memref<1x128xf32, #tpu.memory_space<vmem>>, %arg7: memref<32x32xbf16, #tpu.memory_space<vmem>>, %arg8: memref<1x32xf32, #tpu.memory_space<vmem>>, %arg9: memref<1x32xf32, #tpu.memory_space<vmem>>, %arg10: memref<1x32xf32, #tpu.memory_space<vmem>>, %arg11: memref<32x128xbf16, #tpu.memory_space<vmem>>, %arg12: memref<1x128xf32, #tpu.memory_space<vmem>>, %arg13: memref<4x128xf32, #tpu.memory_space<vmem>>) attributes {dimension_semantics = [], scalar_prefetch = 0 : i64, scratch_operands = 0 : i64, tpu.core_type = #tpu.core_type<tc>} {
    %c0 = arith.constant 0 : index
    %c0_0 = arith.constant 0 : index
    %0 = vector.load %arg1[%c0, %c0_0] : memref<16x128xbf16, #tpu.memory_space<vmem>>, vector<16x128xbf16>
    %c0_1 = arith.constant 0 : index
    %c0_2 = arith.constant 0 : index
    %1 = vector.load %arg4[%c0_1, %c0_2] : memref<32x128xbf16, #tpu.memory_space<vmem>>, vector<32x128xbf16>
    %c0_3 = arith.constant 0 : index
    %c0_4 = arith.constant 0 : index
    %2 = vector.load %arg2[%c0_3, %c0_4] : memref<32x128xbf16, #tpu.memory_space<vmem>>, vector<32x128xbf16>
    %c0_5 = arith.constant 0 : index
    %c0_6 = arith.constant 0 : index
    %3 = vector.load %arg5[%c0_5, %c0_6] : memref<32x128xbf16, #tpu.memory_space<vmem>>, vector<32x128xbf16>
    %c0_7 = arith.constant 0 : index
    %c0_8 = arith.constant 0 : index
    %4 = vector.load %arg3[%c0_7, %c0_8] : memref<1x128xf32, #tpu.memory_space<vmem>>, vector<1x128xf32>
    %c0_9 = arith.constant 0 : index
    %c0_10 = arith.constant 0 : index
    %5 = vector.load %arg6[%c0_9, %c0_10] : memref<1x128xf32, #tpu.memory_space<vmem>>, vector<1x128xf32>
    %c0_11 = arith.constant 0 : index
    %c0_12 = arith.constant 0 : index
    %c0_13 = arith.constant 0 : index
    %6 = vector.load %arg0[%c0_11, %c0_12, %c0_13] : memref<8x4x16xf32, #tpu.memory_space<vmem>>, vector<8x4x16xf32>
    %7 = vector.shape_cast %6 : vector<8x4x16xf32> to vector<32x16xf32>
    %8 = arith.truncf %7 : vector<32x16xf32> to vector<32x16xbf16>
    %cst = arith.constant dense<0.000000e+00> : vector<32x128xf32>
    %9 = tpu.matmul %8, %0, %cst {dimension_numbers = #tpu.dot_dimension_numbers<[1], [0], [0], [1], [0, 0, 1, 1], [], []>} : vector<32x16xbf16>, vector<16x128xbf16>, vector<32x128xf32> -> vector<32x128xf32>
    %10 = vector.broadcast %4 : vector<1x128xf32> to vector<32x128xf32>
    %11 = arith.addf %9, %10 : vector<32x128xf32>
    %12 = vector.shape_cast %11 : vector<32x128xf32> to vector<8x4x128xf32>
    %13 = vector.extract_strided_slice %12 {offsets = [0, 0, 0], sizes = [1, 4, 128], strides = [1, 1, 1]} : vector<8x4x128xf32> to vector<1x4x128xf32>
    %14 = vector.shape_cast %13 : vector<1x4x128xf32> to vector<4x128xf32>
    %15 = arith.negf %14 : vector<4x128xf32>
    %16 = math.exp %15 : vector<4x128xf32>
    %cst_14 = arith.constant 1.000000e+00 : f32
    %17 = vector.broadcast %cst_14 : f32 to vector<4x128xf32>
    %18 = arith.addf %17, %16 : vector<4x128xf32>
    %19 = arith.divf %17, %18 : vector<4x128xf32>
    %20 = vector.extract_strided_slice %19 {offsets = [0, 0], sizes = [4, 32], strides = [1, 1]} : vector<4x128xf32> to vector<4x32xf32>
    %21 = vector.extract_strided_slice %19 {offsets = [0, 96], sizes = [4, 32], strides = [1, 1]} : vector<4x128xf32> to vector<4x32xf32>
    %22 = vector.extract_strided_slice %14 {offsets = [0, 64], sizes = [4, 32], strides = [1, 1]} : vector<4x128xf32> to vector<4x32xf32>
    %23 = math.tanh %22 : vector<4x32xf32>
    %24 = arith.mulf %20, %23 : vector<4x32xf32>
    %25 = math.tanh %24 : vector<4x32xf32>
    %26 = arith.mulf %21, %25 : vector<4x32xf32>
    %27 = vector.extract_strided_slice %12 {offsets = [1, 0, 0], sizes = [1, 4, 128], strides = [1, 1, 1]} : vector<8x4x128xf32> to vector<1x4x128xf32>
    %28 = vector.shape_cast %27 : vector<1x4x128xf32> to vector<4x128xf32>
    %29 = arith.truncf %26 : vector<4x32xf32> to vector<4x32xbf16>
    %cst_15 = arith.constant dense<0.000000e+00> : vector<4x128xf32>
    %30 = tpu.matmul %29, %2, %cst_15 {dimension_numbers = #tpu.dot_dimension_numbers<[1], [0], [0], [1], [0, 0, 1, 1], [], []>} : vector<4x32xbf16>, vector<32x128xbf16>, vector<4x128xf32> -> vector<4x128xf32>
    %31 = arith.addf %28, %30 : vector<4x128xf32>
    %32 = arith.negf %31 : vector<4x128xf32>
    %33 = math.exp %32 : vector<4x128xf32>
    %cst_16 = arith.constant 1.000000e+00 : f32
    %34 = vector.broadcast %cst_16 : f32 to vector<4x128xf32>
    %35 = arith.addf %34, %33 : vector<4x128xf32>
    %36 = arith.divf %34, %35 : vector<4x128xf32>
    %37 = vector.extract_strided_slice %36 {offsets = [0, 0], sizes = [4, 32], strides = [1, 1]} : vector<4x128xf32> to vector<4x32xf32>
    %38 = vector.extract_strided_slice %36 {offsets = [0, 32], sizes = [4, 32], strides = [1, 1]} : vector<4x128xf32> to vector<4x32xf32>
    %39 = vector.extract_strided_slice %36 {offsets = [0, 96], sizes = [4, 32], strides = [1, 1]} : vector<4x128xf32> to vector<4x32xf32>
    %40 = vector.extract_strided_slice %31 {offsets = [0, 64], sizes = [4, 32], strides = [1, 1]} : vector<4x128xf32> to vector<4x32xf32>
    %41 = math.tanh %40 : vector<4x32xf32>
    %42 = arith.mulf %38, %24 : vector<4x32xf32>
    %43 = arith.mulf %37, %41 : vector<4x32xf32>
    %44 = arith.addf %42, %43 : vector<4x32xf32>
    %45 = math.tanh %44 : vector<4x32xf32>
    %46 = arith.mulf %39, %45 : vector<4x32xf32>
    %47 = arith.truncf %26 : vector<4x32xf32> to vector<4x32xbf16>
    %cst_17 = arith.constant dense<0.000000e+00> : vector<4x128xf32>
    %48 = tpu.matmul %47, %1, %cst_17 {dimension_numbers = #tpu.dot_dimension_numbers<[1], [0], [0], [1], [0, 0, 1, 1], [], []>} : vector<4x32xbf16>, vector<32x128xbf16>, vector<4x128xf32> -> vector<4x128xf32>
    %49 = vector.broadcast %5 : vector<1x128xf32> to vector<4x128xf32>
    %50 = arith.addf %48, %49 : vector<4x128xf32>
    %51 = arith.negf %50 : vector<4x128xf32>
    %52 = math.exp %51 : vector<4x128xf32>
    %cst_18 = arith.constant 1.000000e+00 : f32
    %53 = vector.broadcast %cst_18 : f32 to vector<4x128xf32>
    %54 = arith.addf %53, %52 : vector<4x128xf32>
    %55 = arith.divf %53, %54 : vector<4x128xf32>
    %56 = vector.extract_strided_slice %55 {offsets = [0, 0], sizes = [4, 32], strides = [1, 1]} : vector<4x128xf32> to vector<4x32xf32>
    %57 = vector.extract_strided_slice %55 {offsets = [0, 96], sizes = [4, 32], strides = [1, 1]} : vector<4x128xf32> to vector<4x32xf32>
    %58 = vector.extract_strided_slice %50 {offsets = [0, 64], sizes = [4, 32], strides = [1, 1]} : vector<4x128xf32> to vector<4x32xf32>
    %59 = math.tanh %58 : vector<4x32xf32>
    %60 = arith.mulf %56, %59 : vector<4x32xf32>
    %61 = math.tanh %60 : vector<4x32xf32>
    %62 = arith.mulf %57, %61 : vector<4x32xf32>
    %63 = vector.extract_strided_slice %12 {offsets = [2, 0, 0], sizes = [1, 4, 128], strides = [1, 1, 1]} : vector<8x4x128xf32> to vector<1x4x128xf32>
    %64 = vector.shape_cast %63 : vector<1x4x128xf32> to vector<4x128xf32>
    %65 = arith.truncf %46 : vector<4x32xf32> to vector<4x32xbf16>
    %cst_19 = arith.constant dense<0.000000e+00> : vector<4x128xf32>
    %66 = tpu.matmul %65, %2, %cst_19 {dimension_numbers = #tpu.dot_dimension_numbers<[1], [0], [0], [1], [0, 0, 1, 1], [], []>} : vector<4x32xbf16>, vector<32x128xbf16>, vector<4x128xf32> -> vector<4x128xf32>
    %67 = arith.addf %64, %66 : vector<4x128xf32>
    %68 = arith.negf %67 : vector<4x128xf32>
    %69 = math.exp %68 : vector<4x128xf32>
    %cst_20 = arith.constant 1.000000e+00 : f32
    %70 = vector.broadcast %cst_20 : f32 to vector<4x128xf32>
    %71 = arith.addf %70, %69 : vector<4x128xf32>
    %72 = arith.divf %70, %71 : vector<4x128xf32>
    %73 = vector.extract_strided_slice %72 {offsets = [0, 0], sizes = [4, 32], strides = [1, 1]} : vector<4x128xf32> to vector<4x32xf32>
    %74 = vector.extract_strided_slice %72 {offsets = [0, 32], sizes = [4, 32], strides = [1, 1]} : vector<4x128xf32> to vector<4x32xf32>
    %75 = vector.extract_strided_slice %72 {offsets = [0, 96], sizes = [4, 32], strides = [1, 1]} : vector<4x128xf32> to vector<4x32xf32>
    %76 = vector.extract_strided_slice %67 {offsets = [0, 64], sizes = [4, 32], strides = [1, 1]} : vector<4x128xf32> to vector<4x32xf32>
    %77 = math.tanh %76 : vector<4x32xf32>
    %78 = arith.mulf %74, %44 : vector<4x32xf32>
    %79 = arith.mulf %73, %77 : vector<4x32xf32>
    %80 = arith.addf %78, %79 : vector<4x32xf32>
    %81 = math.tanh %80 : vector<4x32xf32>
    %82 = arith.mulf %75, %81 : vector<4x32xf32>
    %83 = arith.truncf %46 : vector<4x32xf32> to vector<4x32xbf16>
    %cst_21 = arith.constant dense<0.000000e+00> : vector<4x128xf32>
    %84 = tpu.matmul %83, %1, %cst_21 {dimension_numbers = #tpu.dot_dimension_numbers<[1], [0], [0], [1], [0, 0, 1, 1], [], []>} : vector<4x32xbf16>, vector<32x128xbf16>, vector<4x128xf32> -> vector<4x128xf32>
    %85 = vector.broadcast %5 : vector<1x128xf32> to vector<4x128xf32>
    %86 = arith.addf %84, %85 : vector<4x128xf32>
    %87 = arith.truncf %62 : vector<4x32xf32> to vector<4x32xbf16>
    %cst_22 = arith.constant dense<0.000000e+00> : vector<4x128xf32>
    %88 = tpu.matmul %87, %3, %cst_22 {dimension_numbers = #tpu.dot_dimension_numbers<[1], [0], [0], [1], [0, 0, 1, 1], [], []>} : vector<4x32xbf16>, vector<32x128xbf16>, vector<4x128xf32> -> vector<4x128xf32>
    %89 = arith.addf %86, %88 : vector<4x128xf32>
    %90 = arith.negf %89 : vector<4x128xf32>
    %91 = math.exp %90 : vector<4x128xf32>
    %cst_23 = arith.constant 1.000000e+00 : f32
    %92 = vector.broadcast %cst_23 : f32 to vector<4x128xf32>
    %93 = arith.addf %92, %91 : vector<4x128xf32>
    %94 = arith.divf %92, %93 : vector<4x128xf32>
    %95 = vector.extract_strided_slice %94 {offsets = [0, 0], sizes = [4, 32], strides = [1, 1]} : vector<4x128xf32> to vector<4x32xf32>
    %96 = vector.extract_strided_slice %94 {offsets = [0, 32], sizes = [4, 32], strides = [1, 1]} : vector<4x128xf32> to vector<4x32xf32>
    %97 = vector.extract_strided_slice %94 {offsets = [0, 96], sizes = [4, 32], strides = [1, 1]} : vector<4x128xf32> to vector<4x32xf32>
    %98 = vector.extract_strided_slice %89 {offsets = [0, 64], sizes = [4, 32], strides = [1, 1]} : vector<4x128xf32> to vector<4x32xf32>
    %99 = math.tanh %98 : vector<4x32xf32>
    %100 = arith.mulf %96, %60 : vector<4x32xf32>
    %101 = arith.mulf %95, %99 : vector<4x32xf32>
    %102 = arith.addf %100, %101 : vector<4x32xf32>
    %103 = math.tanh %102 : vector<4x32xf32>
    %104 = arith.mulf %97, %103 : vector<4x32xf32>
    %105 = vector.extract_strided_slice %12 {offsets = [3, 0, 0], sizes = [1, 4, 128], strides = [1, 1, 1]} : vector<8x4x128xf32> to vector<1x4x128xf32>
    %106 = vector.shape_cast %105 : vector<1x4x128xf32> to vector<4x128xf32>
    %107 = arith.truncf %82 : vector<4x32xf32> to vector<4x32xbf16>
    %cst_24 = arith.constant dense<0.000000e+00> : vector<4x128xf32>
    %108 = tpu.matmul %107, %2, %cst_24 {dimension_numbers = #tpu.dot_dimension_numbers<[1], [0], [0], [1], [0, 0, 1, 1], [], []>} : vector<4x32xbf16>, vector<32x128xbf16>, vector<4x128xf32> -> vector<4x128xf32>
    %109 = arith.addf %106, %108 : vector<4x128xf32>
    %110 = arith.negf %109 : vector<4x128xf32>
    %111 = math.exp %110 : vector<4x128xf32>
    %cst_25 = arith.constant 1.000000e+00 : f32
    %112 = vector.broadcast %cst_25 : f32 to vector<4x128xf32>
    %113 = arith.addf %112, %111 : vector<4x128xf32>
    %114 = arith.divf %112, %113 : vector<4x128xf32>
    %115 = vector.extract_strided_slice %114 {offsets = [0, 0], sizes = [4, 32], strides = [1, 1]} : vector<4x128xf32> to vector<4x32xf32>
    %116 = vector.extract_strided_slice %114 {offsets = [0, 32], sizes = [4, 32], strides = [1, 1]} : vector<4x128xf32> to vector<4x32xf32>
    %117 = vector.extract_strided_slice %114 {offsets = [0, 96], sizes = [4, 32], strides = [1, 1]} : vector<4x128xf32> to vector<4x32xf32>
    %118 = vector.extract_strided_slice %109 {offsets = [0, 64], sizes = [4, 32], strides = [1, 1]} : vector<4x128xf32> to vector<4x32xf32>
    %119 = math.tanh %118 : vector<4x32xf32>
    %120 = arith.mulf %116, %80 : vector<4x32xf32>
    %121 = arith.mulf %115, %119 : vector<4x32xf32>
    %122 = arith.addf %120, %121 : vector<4x32xf32>
    %123 = math.tanh %122 : vector<4x32xf32>
    %124 = arith.mulf %117, %123 : vector<4x32xf32>
    %125 = arith.truncf %82 : vector<4x32xf32> to vector<4x32xbf16>
    %cst_26 = arith.constant dense<0.000000e+00> : vector<4x128xf32>
    %126 = tpu.matmul %125, %1, %cst_26 {dimension_numbers = #tpu.dot_dimension_numbers<[1], [0], [0], [1], [0, 0, 1, 1], [], []>} : vector<4x32xbf16>, vector<32x128xbf16>, vector<4x128xf32> -> vector<4x128xf32>
    %127 = vector.broadcast %5 : vector<1x128xf32> to vector<4x128xf32>
    %128 = arith.addf %126, %127 : vector<4x128xf32>
    %129 = arith.truncf %104 : vector<4x32xf32> to vector<4x32xbf16>
    %cst_27 = arith.constant dense<0.000000e+00> : vector<4x128xf32>
    %130 = tpu.matmul %129, %3, %cst_27 {dimension_numbers = #tpu.dot_dimension_numbers<[1], [0], [0], [1], [0, 0, 1, 1], [], []>} : vector<4x32xbf16>, vector<32x128xbf16>, vector<4x128xf32> -> vector<4x128xf32>
    %131 = arith.addf %128, %130 : vector<4x128xf32>
    %132 = arith.negf %131 : vector<4x128xf32>
    %133 = math.exp %132 : vector<4x128xf32>
    %cst_28 = arith.constant 1.000000e+00 : f32
    %134 = vector.broadcast %cst_28 : f32 to vector<4x128xf32>
    %135 = arith.addf %134, %133 : vector<4x128xf32>
    %136 = arith.divf %134, %135 : vector<4x128xf32>
    %137 = vector.extract_strided_slice %136 {offsets = [0, 0], sizes = [4, 32], strides = [1, 1]} : vector<4x128xf32> to vector<4x32xf32>
    %138 = vector.extract_strided_slice %136 {offsets = [0, 32], sizes = [4, 32], strides = [1, 1]} : vector<4x128xf32> to vector<4x32xf32>
    %139 = vector.extract_strided_slice %136 {offsets = [0, 96], sizes = [4, 32], strides = [1, 1]} : vector<4x128xf32> to vector<4x32xf32>
    %140 = vector.extract_strided_slice %131 {offsets = [0, 64], sizes = [4, 32], strides = [1, 1]} : vector<4x128xf32> to vector<4x32xf32>
    %141 = math.tanh %140 : vector<4x32xf32>
    %142 = arith.mulf %138, %102 : vector<4x32xf32>
    %143 = arith.mulf %137, %141 : vector<4x32xf32>
    %144 = arith.addf %142, %143 : vector<4x32xf32>
    %145 = math.tanh %144 : vector<4x32xf32>
    %146 = arith.mulf %139, %145 : vector<4x32xf32>
    %147 = vector.extract_strided_slice %12 {offsets = [4, 0, 0], sizes = [1, 4, 128], strides = [1, 1, 1]} : vector<8x4x128xf32> to vector<1x4x128xf32>
    %148 = vector.shape_cast %147 : vector<1x4x128xf32> to vector<4x128xf32>
    %149 = arith.truncf %124 : vector<4x32xf32> to vector<4x32xbf16>
    %cst_29 = arith.constant dense<0.000000e+00> : vector<4x128xf32>
    %150 = tpu.matmul %149, %2, %cst_29 {dimension_numbers = #tpu.dot_dimension_numbers<[1], [0], [0], [1], [0, 0, 1, 1], [], []>} : vector<4x32xbf16>, vector<32x128xbf16>, vector<4x128xf32> -> vector<4x128xf32>
    %151 = arith.addf %148, %150 : vector<4x128xf32>
    %152 = arith.negf %151 : vector<4x128xf32>
    %153 = math.exp %152 : vector<4x128xf32>
    %cst_30 = arith.constant 1.000000e+00 : f32
    %154 = vector.broadcast %cst_30 : f32 to vector<4x128xf32>
    %155 = arith.addf %154, %153 : vector<4x128xf32>
    %156 = arith.divf %154, %155 : vector<4x128xf32>
    %157 = vector.extract_strided_slice %156 {offsets = [0, 0], sizes = [4, 32], strides = [1, 1]} : vector<4x128xf32> to vector<4x32xf32>
    %158 = vector.extract_strided_slice %156 {offsets = [0, 32], sizes = [4, 32], strides = [1, 1]} : vector<4x128xf32> to vector<4x32xf32>
    %159 = vector.extract_strided_slice %156 {offsets = [0, 96], sizes = [4, 32], strides = [1, 1]} : vector<4x128xf32> to vector<4x32xf32>
    %160 = vector.extract_strided_slice %151 {offsets = [0, 64], sizes = [4, 32], strides = [1, 1]} : vector<4x128xf32> to vector<4x32xf32>
    %161 = math.tanh %160 : vector<4x32xf32>
    %162 = arith.mulf %158, %122 : vector<4x32xf32>
    %163 = arith.mulf %157, %161 : vector<4x32xf32>
    %164 = arith.addf %162, %163 : vector<4x32xf32>
    %165 = math.tanh %164 : vector<4x32xf32>
    %166 = arith.mulf %159, %165 : vector<4x32xf32>
    %167 = arith.truncf %124 : vector<4x32xf32> to vector<4x32xbf16>
    %cst_31 = arith.constant dense<0.000000e+00> : vector<4x128xf32>
    %168 = tpu.matmul %167, %1, %cst_31 {dimension_numbers = #tpu.dot_dimension_numbers<[1], [0], [0], [1], [0, 0, 1, 1], [], []>} : vector<4x32xbf16>, vector<32x128xbf16>, vector<4x128xf32> -> vector<4x128xf32>
    %169 = vector.broadcast %5 : vector<1x128xf32> to vector<4x128xf32>
    %170 = arith.addf %168, %169 : vector<4x128xf32>
    %171 = arith.truncf %146 : vector<4x32xf32> to vector<4x32xbf16>
    %cst_32 = arith.constant dense<0.000000e+00> : vector<4x128xf32>
    %172 = tpu.matmul %171, %3, %cst_32 {dimension_numbers = #tpu.dot_dimension_numbers<[1], [0], [0], [1], [0, 0, 1, 1], [], []>} : vector<4x32xbf16>, vector<32x128xbf16>, vector<4x128xf32> -> vector<4x128xf32>
    %173 = arith.addf %170, %172 : vector<4x128xf32>
    %174 = arith.negf %173 : vector<4x128xf32>
    %175 = math.exp %174 : vector<4x128xf32>
    %cst_33 = arith.constant 1.000000e+00 : f32
    %176 = vector.broadcast %cst_33 : f32 to vector<4x128xf32>
    %177 = arith.addf %176, %175 : vector<4x128xf32>
    %178 = arith.divf %176, %177 : vector<4x128xf32>
    %179 = vector.extract_strided_slice %178 {offsets = [0, 0], sizes = [4, 32], strides = [1, 1]} : vector<4x128xf32> to vector<4x32xf32>
    %180 = vector.extract_strided_slice %178 {offsets = [0, 32], sizes = [4, 32], strides = [1, 1]} : vector<4x128xf32> to vector<4x32xf32>
    %181 = vector.extract_strided_slice %178 {offsets = [0, 96], sizes = [4, 32], strides = [1, 1]} : vector<4x128xf32> to vector<4x32xf32>
    %182 = vector.extract_strided_slice %173 {offsets = [0, 64], sizes = [4, 32], strides = [1, 1]} : vector<4x128xf32> to vector<4x32xf32>
    %183 = math.tanh %182 : vector<4x32xf32>
    %184 = arith.mulf %180, %144 : vector<4x32xf32>
    %185 = arith.mulf %179, %183 : vector<4x32xf32>
    %186 = arith.addf %184, %185 : vector<4x32xf32>
    %187 = math.tanh %186 : vector<4x32xf32>
    %188 = arith.mulf %181, %187 : vector<4x32xf32>
    %189 = vector.extract_strided_slice %12 {offsets = [5, 0, 0], sizes = [1, 4, 128], strides = [1, 1, 1]} : vector<8x4x128xf32> to vector<1x4x128xf32>
    %190 = vector.shape_cast %189 : vector<1x4x128xf32> to vector<4x128xf32>
    %191 = arith.truncf %166 : vector<4x32xf32> to vector<4x32xbf16>
    %cst_34 = arith.constant dense<0.000000e+00> : vector<4x128xf32>
    %192 = tpu.matmul %191, %2, %cst_34 {dimension_numbers = #tpu.dot_dimension_numbers<[1], [0], [0], [1], [0, 0, 1, 1], [], []>} : vector<4x32xbf16>, vector<32x128xbf16>, vector<4x128xf32> -> vector<4x128xf32>
    %193 = arith.addf %190, %192 : vector<4x128xf32>
    %194 = arith.negf %193 : vector<4x128xf32>
    %195 = math.exp %194 : vector<4x128xf32>
    %cst_35 = arith.constant 1.000000e+00 : f32
    %196 = vector.broadcast %cst_35 : f32 to vector<4x128xf32>
    %197 = arith.addf %196, %195 : vector<4x128xf32>
    %198 = arith.divf %196, %197 : vector<4x128xf32>
    %199 = vector.extract_strided_slice %198 {offsets = [0, 0], sizes = [4, 32], strides = [1, 1]} : vector<4x128xf32> to vector<4x32xf32>
    %200 = vector.extract_strided_slice %198 {offsets = [0, 32], sizes = [4, 32], strides = [1, 1]} : vector<4x128xf32> to vector<4x32xf32>
    %201 = vector.extract_strided_slice %198 {offsets = [0, 96], sizes = [4, 32], strides = [1, 1]} : vector<4x128xf32> to vector<4x32xf32>
    %202 = vector.extract_strided_slice %193 {offsets = [0, 64], sizes = [4, 32], strides = [1, 1]} : vector<4x128xf32> to vector<4x32xf32>
    %203 = math.tanh %202 : vector<4x32xf32>
    %204 = arith.mulf %200, %164 : vector<4x32xf32>
    %205 = arith.mulf %199, %203 : vector<4x32xf32>
    %206 = arith.addf %204, %205 : vector<4x32xf32>
    %207 = math.tanh %206 : vector<4x32xf32>
    %208 = arith.mulf %201, %207 : vector<4x32xf32>
    %209 = arith.truncf %166 : vector<4x32xf32> to vector<4x32xbf16>
    %cst_36 = arith.constant dense<0.000000e+00> : vector<4x128xf32>
    %210 = tpu.matmul %209, %1, %cst_36 {dimension_numbers = #tpu.dot_dimension_numbers<[1], [0], [0], [1], [0, 0, 1, 1], [], []>} : vector<4x32xbf16>, vector<32x128xbf16>, vector<4x128xf32> -> vector<4x128xf32>
    %211 = vector.broadcast %5 : vector<1x128xf32> to vector<4x128xf32>
    %212 = arith.addf %210, %211 : vector<4x128xf32>
    %213 = arith.truncf %188 : vector<4x32xf32> to vector<4x32xbf16>
    %cst_37 = arith.constant dense<0.000000e+00> : vector<4x128xf32>
    %214 = tpu.matmul %213, %3, %cst_37 {dimension_numbers = #tpu.dot_dimension_numbers<[1], [0], [0], [1], [0, 0, 1, 1], [], []>} : vector<4x32xbf16>, vector<32x128xbf16>, vector<4x128xf32> -> vector<4x128xf32>
    %215 = arith.addf %212, %214 : vector<4x128xf32>
    %216 = arith.negf %215 : vector<4x128xf32>
    %217 = math.exp %216 : vector<4x128xf32>
    %cst_38 = arith.constant 1.000000e+00 : f32
    %218 = vector.broadcast %cst_38 : f32 to vector<4x128xf32>
    %219 = arith.addf %218, %217 : vector<4x128xf32>
    %220 = arith.divf %218, %219 : vector<4x128xf32>
    %221 = vector.extract_strided_slice %220 {offsets = [0, 0], sizes = [4, 32], strides = [1, 1]} : vector<4x128xf32> to vector<4x32xf32>
    %222 = vector.extract_strided_slice %220 {offsets = [0, 32], sizes = [4, 32], strides = [1, 1]} : vector<4x128xf32> to vector<4x32xf32>
    %223 = vector.extract_strided_slice %220 {offsets = [0, 96], sizes = [4, 32], strides = [1, 1]} : vector<4x128xf32> to vector<4x32xf32>
    %224 = vector.extract_strided_slice %215 {offsets = [0, 64], sizes = [4, 32], strides = [1, 1]} : vector<4x128xf32> to vector<4x32xf32>
    %225 = math.tanh %224 : vector<4x32xf32>
    %226 = arith.mulf %222, %186 : vector<4x32xf32>
    %227 = arith.mulf %221, %225 : vector<4x32xf32>
    %228 = arith.addf %226, %227 : vector<4x32xf32>
    %229 = math.tanh %228 : vector<4x32xf32>
    %230 = arith.mulf %223, %229 : vector<4x32xf32>
    %231 = vector.extract_strided_slice %12 {offsets = [6, 0, 0], sizes = [1, 4, 128], strides = [1, 1, 1]} : vector<8x4x128xf32> to vector<1x4x128xf32>
    %232 = vector.shape_cast %231 : vector<1x4x128xf32> to vector<4x128xf32>
    %233 = arith.truncf %208 : vector<4x32xf32> to vector<4x32xbf16>
    %cst_39 = arith.constant dense<0.000000e+00> : vector<4x128xf32>
    %234 = tpu.matmul %233, %2, %cst_39 {dimension_numbers = #tpu.dot_dimension_numbers<[1], [0], [0], [1], [0, 0, 1, 1], [], []>} : vector<4x32xbf16>, vector<32x128xbf16>, vector<4x128xf32> -> vector<4x128xf32>
    %235 = arith.addf %232, %234 : vector<4x128xf32>
    %236 = arith.negf %235 : vector<4x128xf32>
    %237 = math.exp %236 : vector<4x128xf32>
    %cst_40 = arith.constant 1.000000e+00 : f32
    %238 = vector.broadcast %cst_40 : f32 to vector<4x128xf32>
    %239 = arith.addf %238, %237 : vector<4x128xf32>
    %240 = arith.divf %238, %239 : vector<4x128xf32>
    %241 = vector.extract_strided_slice %240 {offsets = [0, 0], sizes = [4, 32], strides = [1, 1]} : vector<4x128xf32> to vector<4x32xf32>
    %242 = vector.extract_strided_slice %240 {offsets = [0, 32], sizes = [4, 32], strides = [1, 1]} : vector<4x128xf32> to vector<4x32xf32>
    %243 = vector.extract_strided_slice %240 {offsets = [0, 96], sizes = [4, 32], strides = [1, 1]} : vector<4x128xf32> to vector<4x32xf32>
    %244 = vector.extract_strided_slice %235 {offsets = [0, 64], sizes = [4, 32], strides = [1, 1]} : vector<4x128xf32> to vector<4x32xf32>
    %245 = math.tanh %244 : vector<4x32xf32>
    %246 = arith.mulf %242, %206 : vector<4x32xf32>
    %247 = arith.mulf %241, %245 : vector<4x32xf32>
    %248 = arith.addf %246, %247 : vector<4x32xf32>
    %249 = math.tanh %248 : vector<4x32xf32>
    %250 = arith.mulf %243, %249 : vector<4x32xf32>
    %251 = arith.truncf %208 : vector<4x32xf32> to vector<4x32xbf16>
    %cst_41 = arith.constant dense<0.000000e+00> : vector<4x128xf32>
    %252 = tpu.matmul %251, %1, %cst_41 {dimension_numbers = #tpu.dot_dimension_numbers<[1], [0], [0], [1], [0, 0, 1, 1], [], []>} : vector<4x32xbf16>, vector<32x128xbf16>, vector<4x128xf32> -> vector<4x128xf32>
    %253 = vector.broadcast %5 : vector<1x128xf32> to vector<4x128xf32>
    %254 = arith.addf %252, %253 : vector<4x128xf32>
    %255 = arith.truncf %230 : vector<4x32xf32> to vector<4x32xbf16>
    %cst_42 = arith.constant dense<0.000000e+00> : vector<4x128xf32>
    %256 = tpu.matmul %255, %3, %cst_42 {dimension_numbers = #tpu.dot_dimension_numbers<[1], [0], [0], [1], [0, 0, 1, 1], [], []>} : vector<4x32xbf16>, vector<32x128xbf16>, vector<4x128xf32> -> vector<4x128xf32>
    %257 = arith.addf %254, %256 : vector<4x128xf32>
    %258 = arith.negf %257 : vector<4x128xf32>
    %259 = math.exp %258 : vector<4x128xf32>
    %cst_43 = arith.constant 1.000000e+00 : f32
    %260 = vector.broadcast %cst_43 : f32 to vector<4x128xf32>
    %261 = arith.addf %260, %259 : vector<4x128xf32>
    %262 = arith.divf %260, %261 : vector<4x128xf32>
    %263 = vector.extract_strided_slice %262 {offsets = [0, 0], sizes = [4, 32], strides = [1, 1]} : vector<4x128xf32> to vector<4x32xf32>
    %264 = vector.extract_strided_slice %262 {offsets = [0, 32], sizes = [4, 32], strides = [1, 1]} : vector<4x128xf32> to vector<4x32xf32>
    %265 = vector.extract_strided_slice %262 {offsets = [0, 96], sizes = [4, 32], strides = [1, 1]} : vector<4x128xf32> to vector<4x32xf32>
    %266 = vector.extract_strided_slice %257 {offsets = [0, 64], sizes = [4, 32], strides = [1, 1]} : vector<4x128xf32> to vector<4x32xf32>
    %267 = math.tanh %266 : vector<4x32xf32>
    %268 = arith.mulf %264, %228 : vector<4x32xf32>
    %269 = arith.mulf %263, %267 : vector<4x32xf32>
    %270 = arith.addf %268, %269 : vector<4x32xf32>
    %271 = math.tanh %270 : vector<4x32xf32>
    %272 = arith.mulf %265, %271 : vector<4x32xf32>
    %273 = vector.extract_strided_slice %12 {offsets = [7, 0, 0], sizes = [1, 4, 128], strides = [1, 1, 1]} : vector<8x4x128xf32> to vector<1x4x128xf32>
    %274 = vector.shape_cast %273 : vector<1x4x128xf32> to vector<4x128xf32>
    %275 = arith.truncf %250 : vector<4x32xf32> to vector<4x32xbf16>
    %cst_44 = arith.constant dense<0.000000e+00> : vector<4x128xf32>
    %276 = tpu.matmul %275, %2, %cst_44 {dimension_numbers = #tpu.dot_dimension_numbers<[1], [0], [0], [1], [0, 0, 1, 1], [], []>} : vector<4x32xbf16>, vector<32x128xbf16>, vector<4x128xf32> -> vector<4x128xf32>
    %277 = arith.addf %274, %276 : vector<4x128xf32>
    %278 = arith.negf %277 : vector<4x128xf32>
    %279 = math.exp %278 : vector<4x128xf32>
    %cst_45 = arith.constant 1.000000e+00 : f32
    %280 = vector.broadcast %cst_45 : f32 to vector<4x128xf32>
    %281 = arith.addf %280, %279 : vector<4x128xf32>
    %282 = arith.divf %280, %281 : vector<4x128xf32>
    %283 = vector.extract_strided_slice %282 {offsets = [0, 0], sizes = [4, 32], strides = [1, 1]} : vector<4x128xf32> to vector<4x32xf32>
    %284 = vector.extract_strided_slice %282 {offsets = [0, 32], sizes = [4, 32], strides = [1, 1]} : vector<4x128xf32> to vector<4x32xf32>
    %285 = vector.extract_strided_slice %282 {offsets = [0, 96], sizes = [4, 32], strides = [1, 1]} : vector<4x128xf32> to vector<4x32xf32>
    %286 = vector.extract_strided_slice %277 {offsets = [0, 64], sizes = [4, 32], strides = [1, 1]} : vector<4x128xf32> to vector<4x32xf32>
    %287 = math.tanh %286 : vector<4x32xf32>
    %288 = arith.mulf %284, %248 : vector<4x32xf32>
    %289 = arith.mulf %283, %287 : vector<4x32xf32>
    %290 = arith.addf %288, %289 : vector<4x32xf32>
    %291 = math.tanh %290 : vector<4x32xf32>
    %292 = arith.mulf %285, %291 : vector<4x32xf32>
    %293 = arith.truncf %250 : vector<4x32xf32> to vector<4x32xbf16>
    %cst_46 = arith.constant dense<0.000000e+00> : vector<4x128xf32>
    %294 = tpu.matmul %293, %1, %cst_46 {dimension_numbers = #tpu.dot_dimension_numbers<[1], [0], [0], [1], [0, 0, 1, 1], [], []>} : vector<4x32xbf16>, vector<32x128xbf16>, vector<4x128xf32> -> vector<4x128xf32>
    %295 = vector.broadcast %5 : vector<1x128xf32> to vector<4x128xf32>
    %296 = arith.addf %294, %295 : vector<4x128xf32>
    %297 = arith.truncf %272 : vector<4x32xf32> to vector<4x32xbf16>
    %cst_47 = arith.constant dense<0.000000e+00> : vector<4x128xf32>
    %298 = tpu.matmul %297, %3, %cst_47 {dimension_numbers = #tpu.dot_dimension_numbers<[1], [0], [0], [1], [0, 0, 1, 1], [], []>} : vector<4x32xbf16>, vector<32x128xbf16>, vector<4x128xf32> -> vector<4x128xf32>
    %299 = arith.addf %296, %298 : vector<4x128xf32>
    %300 = arith.negf %299 : vector<4x128xf32>
    %301 = math.exp %300 : vector<4x128xf32>
    %cst_48 = arith.constant 1.000000e+00 : f32
    %302 = vector.broadcast %cst_48 : f32 to vector<4x128xf32>
    %303 = arith.addf %302, %301 : vector<4x128xf32>
    %304 = arith.divf %302, %303 : vector<4x128xf32>
    %305 = vector.extract_strided_slice %304 {offsets = [0, 0], sizes = [4, 32], strides = [1, 1]} : vector<4x128xf32> to vector<4x32xf32>
    %306 = vector.extract_strided_slice %304 {offsets = [0, 32], sizes = [4, 32], strides = [1, 1]} : vector<4x128xf32> to vector<4x32xf32>
    %307 = vector.extract_strided_slice %304 {offsets = [0, 96], sizes = [4, 32], strides = [1, 1]} : vector<4x128xf32> to vector<4x32xf32>
    %308 = vector.extract_strided_slice %299 {offsets = [0, 64], sizes = [4, 32], strides = [1, 1]} : vector<4x128xf32> to vector<4x32xf32>
    %309 = math.tanh %308 : vector<4x32xf32>
    %310 = arith.mulf %306, %270 : vector<4x32xf32>
    %311 = arith.mulf %305, %309 : vector<4x32xf32>
    %312 = arith.addf %310, %311 : vector<4x32xf32>
    %313 = math.tanh %312 : vector<4x32xf32>
    %314 = arith.mulf %307, %313 : vector<4x32xf32>
    %315 = arith.truncf %292 : vector<4x32xf32> to vector<4x32xbf16>
    %cst_49 = arith.constant dense<0.000000e+00> : vector<4x128xf32>
    %316 = tpu.matmul %315, %1, %cst_49 {dimension_numbers = #tpu.dot_dimension_numbers<[1], [0], [0], [1], [0, 0, 1, 1], [], []>} : vector<4x32xbf16>, vector<32x128xbf16>, vector<4x128xf32> -> vector<4x128xf32>
    %317 = vector.broadcast %5 : vector<1x128xf32> to vector<4x128xf32>
    %318 = arith.addf %316, %317 : vector<4x128xf32>
    %319 = arith.truncf %314 : vector<4x32xf32> to vector<4x32xbf16>
    %cst_50 = arith.constant dense<0.000000e+00> : vector<4x128xf32>
    %320 = tpu.matmul %319, %3, %cst_50 {dimension_numbers = #tpu.dot_dimension_numbers<[1], [0], [0], [1], [0, 0, 1, 1], [], []>} : vector<4x32xbf16>, vector<32x128xbf16>, vector<4x128xf32> -> vector<4x128xf32>
    %321 = arith.addf %318, %320 : vector<4x128xf32>
    %322 = arith.negf %321 : vector<4x128xf32>
    %323 = math.exp %322 : vector<4x128xf32>
    %cst_51 = arith.constant 1.000000e+00 : f32
    %324 = vector.broadcast %cst_51 : f32 to vector<4x128xf32>
    %325 = arith.addf %324, %323 : vector<4x128xf32>
    %326 = arith.divf %324, %325 : vector<4x128xf32>
    %327 = vector.extract_strided_slice %326 {offsets = [0, 0], sizes = [4, 32], strides = [1, 1]} : vector<4x128xf32> to vector<4x32xf32>
    %328 = vector.extract_strided_slice %326 {offsets = [0, 32], sizes = [4, 32], strides = [1, 1]} : vector<4x128xf32> to vector<4x32xf32>
    %329 = vector.extract_strided_slice %326 {offsets = [0, 96], sizes = [4, 32], strides = [1, 1]} : vector<4x128xf32> to vector<4x32xf32>
    %330 = vector.extract_strided_slice %321 {offsets = [0, 64], sizes = [4, 32], strides = [1, 1]} : vector<4x128xf32> to vector<4x32xf32>
    %331 = math.tanh %330 : vector<4x32xf32>
    %332 = arith.mulf %328, %312 : vector<4x32xf32>
    %333 = arith.mulf %327, %331 : vector<4x32xf32>
    %334 = arith.addf %332, %333 : vector<4x32xf32>
    %335 = math.tanh %334 : vector<4x32xf32>
    %336 = arith.mulf %329, %335 : vector<4x32xf32>
    %c0_52 = arith.constant 0 : index
    %c0_53 = arith.constant 0 : index
    %337 = vector.load %arg7[%c0_52, %c0_53] : memref<32x32xbf16, #tpu.memory_space<vmem>>, vector<32x32xbf16>
    %c0_54 = arith.constant 0 : index
    %c0_55 = arith.constant 0 : index
    %338 = vector.load %arg8[%c0_54, %c0_55] : memref<1x32xf32, #tpu.memory_space<vmem>>, vector<1x32xf32>
    %cst_56 = arith.constant 0.000000e+00 : f32
    %339 = vector.broadcast %cst_56 : f32 to vector<4x32xf32>
    %cst_57 = arith.constant 0.000000e+00 : f32
    %340 = vector.broadcast %cst_57 : f32 to vector<4x32xf32>
    %cst_58 = arith.constant 0.000000e+00 : f32
    %341 = vector.broadcast %cst_58 : f32 to vector<4x32xf32>
    %342 = arith.maximumf %62, %341 : vector<4x32xf32>
    %343 = arith.truncf %342 : vector<4x32xf32> to vector<4x32xbf16>
    %cst_59 = arith.constant dense<0.000000e+00> : vector<4x32xf32>
    %344 = tpu.matmul %343, %337, %cst_59 {dimension_numbers = #tpu.dot_dimension_numbers<[1], [0], [0], [1], [0, 0, 1, 1], [], []>} : vector<4x32xbf16>, vector<32x32xbf16>, vector<4x32xf32> -> vector<4x32xf32>
    %345 = vector.broadcast %338 : vector<1x32xf32> to vector<4x32xf32>
    %346 = arith.addf %344, %345 : vector<4x32xf32>
    %347 = arith.addf %339, %346 : vector<4x32xf32>
    %348 = arith.mulf %346, %346 : vector<4x32xf32>
    %349 = arith.addf %340, %348 : vector<4x32xf32>
    %cst_60 = arith.constant 0.000000e+00 : f32
    %350 = vector.broadcast %cst_60 : f32 to vector<4x32xf32>
    %351 = arith.maximumf %104, %350 : vector<4x32xf32>
    %352 = arith.truncf %351 : vector<4x32xf32> to vector<4x32xbf16>
    %cst_61 = arith.constant dense<0.000000e+00> : vector<4x32xf32>
    %353 = tpu.matmul %352, %337, %cst_61 {dimension_numbers = #tpu.dot_dimension_numbers<[1], [0], [0], [1], [0, 0, 1, 1], [], []>} : vector<4x32xbf16>, vector<32x32xbf16>, vector<4x32xf32> -> vector<4x32xf32>
    %354 = vector.broadcast %338 : vector<1x32xf32> to vector<4x32xf32>
    %355 = arith.addf %353, %354 : vector<4x32xf32>
    %356 = arith.addf %347, %355 : vector<4x32xf32>
    %357 = arith.mulf %355, %355 : vector<4x32xf32>
    %358 = arith.addf %349, %357 : vector<4x32xf32>
    %cst_62 = arith.constant 0.000000e+00 : f32
    %359 = vector.broadcast %cst_62 : f32 to vector<4x32xf32>
    %360 = arith.maximumf %146, %359 : vector<4x32xf32>
    %361 = arith.truncf %360 : vector<4x32xf32> to vector<4x32xbf16>
    %cst_63 = arith.constant dense<0.000000e+00> : vector<4x32xf32>
    %362 = tpu.matmul %361, %337, %cst_63 {dimension_numbers = #tpu.dot_dimension_numbers<[1], [0], [0], [1], [0, 0, 1, 1], [], []>} : vector<4x32xbf16>, vector<32x32xbf16>, vector<4x32xf32> -> vector<4x32xf32>
    %363 = vector.broadcast %338 : vector<1x32xf32> to vector<4x32xf32>
    %364 = arith.addf %362, %363 : vector<4x32xf32>
    %365 = arith.addf %356, %364 : vector<4x32xf32>
    %366 = arith.mulf %364, %364 : vector<4x32xf32>
    %367 = arith.addf %358, %366 : vector<4x32xf32>
    %cst_64 = arith.constant 0.000000e+00 : f32
    %368 = vector.broadcast %cst_64 : f32 to vector<4x32xf32>
    %369 = arith.maximumf %188, %368 : vector<4x32xf32>
    %370 = arith.truncf %369 : vector<4x32xf32> to vector<4x32xbf16>
    %cst_65 = arith.constant dense<0.000000e+00> : vector<4x32xf32>
    %371 = tpu.matmul %370, %337, %cst_65 {dimension_numbers = #tpu.dot_dimension_numbers<[1], [0], [0], [1], [0, 0, 1, 1], [], []>} : vector<4x32xbf16>, vector<32x32xbf16>, vector<4x32xf32> -> vector<4x32xf32>
    %372 = vector.broadcast %338 : vector<1x32xf32> to vector<4x32xf32>
    %373 = arith.addf %371, %372 : vector<4x32xf32>
    %374 = arith.addf %365, %373 : vector<4x32xf32>
    %375 = arith.mulf %373, %373 : vector<4x32xf32>
    %376 = arith.addf %367, %375 : vector<4x32xf32>
    %cst_66 = arith.constant 0.000000e+00 : f32
    %377 = vector.broadcast %cst_66 : f32 to vector<4x32xf32>
    %378 = arith.maximumf %230, %377 : vector<4x32xf32>
    %379 = arith.truncf %378 : vector<4x32xf32> to vector<4x32xbf16>
    %cst_67 = arith.constant dense<0.000000e+00> : vector<4x32xf32>
    %380 = tpu.matmul %379, %337, %cst_67 {dimension_numbers = #tpu.dot_dimension_numbers<[1], [0], [0], [1], [0, 0, 1, 1], [], []>} : vector<4x32xbf16>, vector<32x32xbf16>, vector<4x32xf32> -> vector<4x32xf32>
    %381 = vector.broadcast %338 : vector<1x32xf32> to vector<4x32xf32>
    %382 = arith.addf %380, %381 : vector<4x32xf32>
    %383 = arith.addf %374, %382 : vector<4x32xf32>
    %384 = arith.mulf %382, %382 : vector<4x32xf32>
    %385 = arith.addf %376, %384 : vector<4x32xf32>
    %cst_68 = arith.constant 0.000000e+00 : f32
    %386 = vector.broadcast %cst_68 : f32 to vector<4x32xf32>
    %387 = arith.maximumf %272, %386 : vector<4x32xf32>
    %388 = arith.truncf %387 : vector<4x32xf32> to vector<4x32xbf16>
    %cst_69 = arith.constant dense<0.000000e+00> : vector<4x32xf32>
    %389 = tpu.matmul %388, %337, %cst_69 {dimension_numbers = #tpu.dot_dimension_numbers<[1], [0], [0], [1], [0, 0, 1, 1], [], []>} : vector<4x32xbf16>, vector<32x32xbf16>, vector<4x32xf32> -> vector<4x32xf32>
    %390 = vector.broadcast %338 : vector<1x32xf32> to vector<4x32xf32>
    %391 = arith.addf %389, %390 : vector<4x32xf32>
    %392 = arith.addf %383, %391 : vector<4x32xf32>
    %393 = arith.mulf %391, %391 : vector<4x32xf32>
    %394 = arith.addf %385, %393 : vector<4x32xf32>
    %cst_70 = arith.constant 0.000000e+00 : f32
    %395 = vector.broadcast %cst_70 : f32 to vector<4x32xf32>
    %396 = arith.maximumf %314, %395 : vector<4x32xf32>
    %397 = arith.truncf %396 : vector<4x32xf32> to vector<4x32xbf16>
    %cst_71 = arith.constant dense<0.000000e+00> : vector<4x32xf32>
    %398 = tpu.matmul %397, %337, %cst_71 {dimension_numbers = #tpu.dot_dimension_numbers<[1], [0], [0], [1], [0, 0, 1, 1], [], []>} : vector<4x32xbf16>, vector<32x32xbf16>, vector<4x32xf32> -> vector<4x32xf32>
    %399 = vector.broadcast %338 : vector<1x32xf32> to vector<4x32xf32>
    %400 = arith.addf %398, %399 : vector<4x32xf32>
    %401 = arith.addf %392, %400 : vector<4x32xf32>
    %402 = arith.mulf %400, %400 : vector<4x32xf32>
    %403 = arith.addf %394, %402 : vector<4x32xf32>
    %cst_72 = arith.constant 0.000000e+00 : f32
    %404 = vector.broadcast %cst_72 : f32 to vector<4x32xf32>
    %405 = arith.maximumf %336, %404 : vector<4x32xf32>
    %406 = arith.truncf %405 : vector<4x32xf32> to vector<4x32xbf16>
    %cst_73 = arith.constant dense<0.000000e+00> : vector<4x32xf32>
    %407 = tpu.matmul %406, %337, %cst_73 {dimension_numbers = #tpu.dot_dimension_numbers<[1], [0], [0], [1], [0, 0, 1, 1], [], []>} : vector<4x32xbf16>, vector<32x32xbf16>, vector<4x32xf32> -> vector<4x32xf32>
    %408 = vector.broadcast %338 : vector<1x32xf32> to vector<4x32xf32>
    %409 = arith.addf %407, %408 : vector<4x32xf32>
    %410 = arith.addf %401, %409 : vector<4x32xf32>
    %411 = arith.mulf %409, %409 : vector<4x32xf32>
    %412 = arith.addf %403, %411 : vector<4x32xf32>
    %cst_74 = arith.constant dense<0.000000e+00> : vector<32xf32>
    %413 = vector.multi_reduction <add>, %410, %cst_74 [0] : vector<4x32xf32> to vector<32xf32>
    %414 = vector.shape_cast %413 : vector<32xf32> to vector<1x32xf32>
    %cst_75 = arith.constant 3.125000e-02 : f32
    %415 = vector.broadcast %cst_75 : f32 to vector<1x32xf32>
    %416 = arith.mulf %414, %415 : vector<1x32xf32>
    %cst_76 = arith.constant dense<0.000000e+00> : vector<32xf32>
    %417 = vector.multi_reduction <add>, %412, %cst_76 [0] : vector<4x32xf32> to vector<32xf32>
    %418 = vector.shape_cast %417 : vector<32xf32> to vector<1x32xf32>
    %cst_77 = arith.constant 3.125000e-02 : f32
    %419 = vector.broadcast %cst_77 : f32 to vector<1x32xf32>
    %420 = arith.mulf %418, %419 : vector<1x32xf32>
    %421 = arith.mulf %416, %416 : vector<1x32xf32>
    %422 = arith.subf %420, %421 : vector<1x32xf32>
    %c0_78 = arith.constant 0 : index
    %c0_79 = arith.constant 0 : index
    %423 = vector.load %arg9[%c0_78, %c0_79] : memref<1x32xf32, #tpu.memory_space<vmem>>, vector<1x32xf32>
    %cst_80 = arith.constant 9.99999974E-6 : f32
    %424 = vector.broadcast %cst_80 : f32 to vector<1x32xf32>
    %425 = arith.addf %422, %424 : vector<1x32xf32>
    %426 = math.rsqrt %425 : vector<1x32xf32>
    %427 = arith.mulf %423, %426 : vector<1x32xf32>
    %c0_81 = arith.constant 0 : index
    %c0_82 = arith.constant 0 : index
    %428 = vector.load %arg10[%c0_81, %c0_82] : memref<1x32xf32, #tpu.memory_space<vmem>>, vector<1x32xf32>
    %429 = arith.mulf %416, %427 : vector<1x32xf32>
    %430 = arith.subf %428, %429 : vector<1x32xf32>
    %cst_83 = arith.constant 0.000000e+00 : f32
    %431 = vector.broadcast %cst_83 : f32 to vector<4x32xf32>
    %432 = vector.broadcast %427 : vector<1x32xf32> to vector<4x32xf32>
    %433 = arith.mulf %346, %432 : vector<4x32xf32>
    %434 = vector.broadcast %430 : vector<1x32xf32> to vector<4x32xf32>
    %435 = arith.addf %433, %434 : vector<4x32xf32>
    %cst_84 = arith.constant 0.000000e+00 : f32
    %436 = vector.broadcast %cst_84 : f32 to vector<4x32xf32>
    %437 = arith.maximumf %435, %436 : vector<4x32xf32>
    %438 = arith.addf %431, %437 : vector<4x32xf32>
    %439 = vector.broadcast %427 : vector<1x32xf32> to vector<4x32xf32>
    %440 = arith.mulf %355, %439 : vector<4x32xf32>
    %441 = vector.broadcast %430 : vector<1x32xf32> to vector<4x32xf32>
    %442 = arith.addf %440, %441 : vector<4x32xf32>
    %cst_85 = arith.constant 0.000000e+00 : f32
    %443 = vector.broadcast %cst_85 : f32 to vector<4x32xf32>
    %444 = arith.maximumf %442, %443 : vector<4x32xf32>
    %445 = arith.addf %438, %444 : vector<4x32xf32>
    %446 = vector.broadcast %427 : vector<1x32xf32> to vector<4x32xf32>
    %447 = arith.mulf %364, %446 : vector<4x32xf32>
    %448 = vector.broadcast %430 : vector<1x32xf32> to vector<4x32xf32>
    %449 = arith.addf %447, %448 : vector<4x32xf32>
    %cst_86 = arith.constant 0.000000e+00 : f32
    %450 = vector.broadcast %cst_86 : f32 to vector<4x32xf32>
    %451 = arith.maximumf %449, %450 : vector<4x32xf32>
    %452 = arith.addf %445, %451 : vector<4x32xf32>
    %453 = vector.broadcast %427 : vector<1x32xf32> to vector<4x32xf32>
    %454 = arith.mulf %373, %453 : vector<4x32xf32>
    %455 = vector.broadcast %430 : vector<1x32xf32> to vector<4x32xf32>
    %456 = arith.addf %454, %455 : vector<4x32xf32>
    %cst_87 = arith.constant 0.000000e+00 : f32
    %457 = vector.broadcast %cst_87 : f32 to vector<4x32xf32>
    %458 = arith.maximumf %456, %457 : vector<4x32xf32>
    %459 = arith.addf %452, %458 : vector<4x32xf32>
    %460 = vector.broadcast %427 : vector<1x32xf32> to vector<4x32xf32>
    %461 = arith.mulf %382, %460 : vector<4x32xf32>
    %462 = vector.broadcast %430 : vector<1x32xf32> to vector<4x32xf32>
    %463 = arith.addf %461, %462 : vector<4x32xf32>
    %cst_88 = arith.constant 0.000000e+00 : f32
    %464 = vector.broadcast %cst_88 : f32 to vector<4x32xf32>
    %465 = arith.maximumf %463, %464 : vector<4x32xf32>
    %466 = arith.addf %459, %465 : vector<4x32xf32>
    %467 = vector.broadcast %427 : vector<1x32xf32> to vector<4x32xf32>
    %468 = arith.mulf %391, %467 : vector<4x32xf32>
    %469 = vector.broadcast %430 : vector<1x32xf32> to vector<4x32xf32>
    %470 = arith.addf %468, %469 : vector<4x32xf32>
    %cst_89 = arith.constant 0.000000e+00 : f32
    %471 = vector.broadcast %cst_89 : f32 to vector<4x32xf32>
    %472 = arith.maximumf %470, %471 : vector<4x32xf32>
    %473 = arith.addf %466, %472 : vector<4x32xf32>
    %474 = vector.broadcast %427 : vector<1x32xf32> to vector<4x32xf32>
    %475 = arith.mulf %400, %474 : vector<4x32xf32>
    %476 = vector.broadcast %430 : vector<1x32xf32> to vector<4x32xf32>
    %477 = arith.addf %475, %476 : vector<4x32xf32>
    %cst_90 = arith.constant 0.000000e+00 : f32
    %478 = vector.broadcast %cst_90 : f32 to vector<4x32xf32>
    %479 = arith.maximumf %477, %478 : vector<4x32xf32>
    %480 = arith.addf %473, %479 : vector<4x32xf32>
    %481 = vector.broadcast %427 : vector<1x32xf32> to vector<4x32xf32>
    %482 = arith.mulf %409, %481 : vector<4x32xf32>
    %483 = vector.broadcast %430 : vector<1x32xf32> to vector<4x32xf32>
    %484 = arith.addf %482, %483 : vector<4x32xf32>
    %cst_91 = arith.constant 0.000000e+00 : f32
    %485 = vector.broadcast %cst_91 : f32 to vector<4x32xf32>
    %486 = arith.maximumf %484, %485 : vector<4x32xf32>
    %487 = arith.addf %480, %486 : vector<4x32xf32>
    %cst_92 = arith.constant 1.250000e-01 : f32
    %488 = vector.broadcast %cst_92 : f32 to vector<4x32xf32>
    %489 = arith.mulf %487, %488 : vector<4x32xf32>
    %490 = arith.truncf %489 : vector<4x32xf32> to vector<4x32xbf16>
    %c0_93 = arith.constant 0 : index
    %c0_94 = arith.constant 0 : index
    %491 = vector.load %arg11[%c0_93, %c0_94] : memref<32x128xbf16, #tpu.memory_space<vmem>>, vector<32x128xbf16>
    %cst_95 = arith.constant dense<0.000000e+00> : vector<4x128xf32>
    %492 = tpu.matmul %490, %491, %cst_95 {dimension_numbers = #tpu.dot_dimension_numbers<[1], [0], [0], [1], [0, 0, 1, 1], [], []>} : vector<4x32xbf16>, vector<32x128xbf16>, vector<4x128xf32> -> vector<4x128xf32>
    %c0_96 = arith.constant 0 : index
    %c0_97 = arith.constant 0 : index
    %493 = vector.load %arg12[%c0_96, %c0_97] : memref<1x128xf32, #tpu.memory_space<vmem>>, vector<1x128xf32>
    %494 = vector.broadcast %493 : vector<1x128xf32> to vector<4x128xf32>
    %495 = arith.addf %492, %494 : vector<4x128xf32>
    %c0_98 = arith.constant 0 : index
    %c0_99 = arith.constant 0 : index
    %496 = vector.load %arg13[%c0_98, %c0_99] : memref<4x128xf32, #tpu.memory_space<vmem>>, vector<4x128xf32>
    tpu.vector_store %arg13[%c0_98, %c0_99], %495 {strides = array<i32>} : memref<4x128xf32, #tpu.memory_space<vmem>>, vector<4x128xf32>,
    return
  }
}

</mosaic_0001>

<bundles_post_ra>
// kernel: rnn_forward.1
= control target key start
LH: loop header
LB: loop body
LE: loop exit
PB: predicated region body
PF: predicated region fallthrough
CT: control target
= control target key end

     0   :  { %18 = vsyncpa [#allocation3], 0  ;;  %s3624_s0 = inlined_call_operand.vmem [shape: f32[8,4,16], index: 0, kind: input, shape index: {}]   ;;  %s3625_s1 = inlined_call_operand.hbm [shape: bf16[16,128], index: 1, kind: input, shape index: {}]   ;;  %s3626_s2 = inlined_call_operand.vmem [shape: bf16[32,128], index: 2, kind: input, shape index: {}]   ;;  %s3627_s3 = inlined_call_operand.vmem [shape: f32[1,128], index: 3, kind: input, shape index: {}]   ;;  %s3628_s4 = inlined_call_operand.vmem [shape: bf16[32,128], index: 4, kind: input, shape index: {}]   ;;  %s3629_s5 = inlined_call_operand.vmem [shape: bf16[32,128], index: 5, kind: input, shape index: {}]   ;;  %s3630_s6 = inlined_call_operand.vmem [shape: f32[1,128], index: 6, kind: input, shape index: {}]   ;;  %s3631_s7 = inlined_call_operand.vmem [shape: bf16[32,32], index: 7, kind: input, shape index: {}]   ;;  %s3632_s8 = inlined_call_operand.hbm [shape: f32[1,32], index: 8, kind: input, shape index: {}]   ;;  %s3633_s9 = inlined_call_operand.hbm [shape: f32[1,32], index: 9, kind: input, shape index: {}]   ;;  %s3634_s10 = inlined_call_operand.hbm [shape: f32[1,32], index: 10, kind: input, shape index: {}]   ;;  %s3635_s11 = inlined_call_operand.vmem [shape: bf16[32,128], index: 11, kind: input, shape index: {}]   ;;  %s3636_s12 = inlined_call_operand.hbm [shape: f32[1,128], index: 12, kind: input, shape index: {}]   ;;  %s3637_s13 = inlined_call_operand.hbm [shape: f32[4,128], index: 13, kind: output, shape index: {}]  }
   0x1   :  { %19 = vsyncpa [#allocation6], 0 }
   0x2   :  { %20 = vsyncpa [#allocation9], 0 }
   0x3   :  { %21 = vsyncpa [#allocation4], 0  ;;  %s2983_s25 = smov [#allocation5]   ;;  %s2984_s27 = smov [#allocation8]  }
   0x4   :  { %s54_s26 = sshll.u32 %s2983_s25, 4  ;;  %s74_s28 = sshll.u32 %s2984_s27, 4  ;;  %s55_s26 = int_to_ptr.vmem [resolvable:$true] %s54_s26  ;;  %s75_s28 = int_to_ptr.vmem [resolvable:$true] %s74_s28 }
   0x5   :  { %s2843_s14 = scalar_lea.hbm %s3632_s8, 16 }
   0x6   :  { %p2844_p0 = scmp.ne.s32.totalorder %s3632_s8, %s2843_s14  ;;  %p2847_p1 = scmp.lt.u32.totalorder %s2843_s14, %s3632_s8 }
   0x8   :  { %p2849_p2 = pnand %p2847_p1, %p2844_p0 }
   0xa   :  { %2852 = shalt.err (!%p2849_p2)
}
   0xb   :  { %s2853_s19 = scalar_lea.vmem %s55_s26, 16  ;;  %s2857_s20 = scalar_lea.vmem %s55_s26, 32 }
   0xc   :  { %p2854_p3 = scmp.ne.s32.totalorder %s55_s26, %s2853_s19  ;;  %p2858_p4 = scmp.lt.s32.totalorder %s55_s26, %s55_s26 }
   0xd   :  { %p2859_p5 = scmp.lt.s32.totalorder %s2857_s20, %s2853_s19 }
   0xf   :  { %p2860_p6 = por %p2859_p5, %p2858_p4 }
  0x11   :  { %p2861_p7 = pnand %p2860_p6, %p2854_p3 }
  0x13   :  { %2864 = shalt.err (!%p2861_p7)
}
  0x14   :  { %57 = dma.hbm_to_vmem [thread:$0]  %s3632_s8, 16, %s55_s26, [#allocation6]  }
  0x15   :  { %s2865_s25 = scalar_lea.hbm %s3634_s10, 16 }
  0x16   :  { %p2866_p8 = scmp.ne.s32.totalorder %s3634_s10, %s2865_s25  ;;  %p2869_p9 = scmp.lt.u32.totalorder %s2865_s25, %s3634_s10 }
  0x18   :  { %p2871_p10 = pnand %p2869_p9, %p2866_p8 }
  0x1a   :  { %2874 = shalt.err (!%p2871_p10)
}
  0x1b   :  { %s2875_s15 = scalar_lea.vmem %s75_s28, 16  ;;  %s2879_s16 = scalar_lea.vmem %s75_s28, 32 }
  0x1c   :  { %p2876_p11 = scmp.ne.s32.totalorder %s75_s28, %s2875_s15  ;;  %p2880_p12 = scmp.lt.s32.totalorder %s75_s28, %s75_s28 }
  0x1d   :  { %p2881_p13 = scmp.lt.s32.totalorder %s2879_s16, %s2875_s15 }
  0x1f   :  { %p2882_p0 = por %p2881_p13, %p2880_p12 }
  0x21   :  { %p2883_p1 = pnand %p2882_p0, %p2876_p11 }
  0x23   :  { %2886 = shalt.err (!%p2883_p1)
}
  0x24   :  { %77 = dma.hbm_to_vmem [thread:$0]  %s3634_s10, 16, %s75_s28, [#allocation9]  }
  0x25   :  { %s2985_s17 = smov [#allocation2]   ;;  %s2887_s21 = scalar_lea.hbm %s3625_s1, 128 }
  0x26   :  { %s29_s18 = sshll.u32 %s2985_s17, 4  ;;  %p2888_p2 = scmp.ne.s32.totalorder %s3625_s1, %s2887_s21  ;;  %s30_s18 = int_to_ptr.vmem [resolvable:$true] %s29_s18 }
  0x27   :  { %p2891_p3 = scmp.lt.u32.totalorder %s2887_s21, %s3625_s1 }
  0x29   :  { %p2893_p4 = pnand %p2891_p3, %p2888_p2 }
  0x2b   :  { %2896 = shalt.err (!%p2893_p4)
}
  0x2c   :  { %s2897_s27 = scalar_lea.vmem %s30_s18, 128  ;;  %p2902_p6 = scmp.lt.s32.totalorder %s30_s18, %s30_s18 }
  0x2d   :  { %p2898_p5 = scmp.ne.s32.totalorder %s30_s18, %s2897_s27  ;;  %p2903_p7 = scmp.lt.s32.totalorder %s2897_s27, %s2897_s27 }
  0x2f   :  { %p2904_p8 = por %p2903_p7, %p2902_p6 }
  0x31   :  { %p2905_p9 = pnand %p2904_p8, %p2898_p5 }
  0x33   :  { %2908 = shalt.err (!%p2905_p9)
}
  0x34   :  { %s2986_s10 = smov 64   ;;  %s2987_s28 = smov 4  }
  0x35   :  { %35 = dma.hbm_to_vmem [thread:$0]  %s3625_s1, 128, %s30_s18, [#allocation3], %s2986_s10, %s2986_s10, %s2987_s28  }
  0x36   :  { %s2988_s14 = smov [#allocation7]   ;;  %s2989_s16 = smov [#allocation10]  }
  0x37   :  { %s64_s15 = sshll.u32 %s2988_s14, 4  ;;  %s86_s8 = sshll.u32 %s2989_s16, 4  ;;  %s65_s15 = int_to_ptr.vmem [resolvable:$true] %s64_s15  ;;  %s87_s8 = int_to_ptr.vmem [resolvable:$true] %s86_s8 }
  0x38   :  { %s2909_s19 = scalar_lea.hbm %s3633_s9, 16 }
  0x39   :  { %p2910_p10 = scmp.ne.s32.totalorder %s3633_s9, %s2909_s19  ;;  %p2913_p11 = scmp.lt.u32.totalorder %s2909_s19, %s3633_s9 }
  0x3b   :  { %p2915_p12 = pnand %p2913_p11, %p2910_p10 }
  0x3d   :  { %2918 = shalt.err (!%p2915_p12)
}
  0x3e   :  { %s2919_s1 = scalar_lea.vmem %s65_s15, 16  ;;  %s2923_s18 = scalar_lea.vmem %s65_s15, 32 }
  0x3f   :  { %p2920_p13 = scmp.ne.s32.totalorder %s65_s15, %s2919_s1  ;;  %p2924_p0 = scmp.lt.s32.totalorder %s65_s15, %s65_s15 }
  0x40   :  { %p2925_p1 = scmp.lt.s32.totalorder %s2923_s18, %s2919_s1 }
  0x42   :  { %p2926_p2 = por %p2925_p1, %p2924_p0 }
  0x44   :  { %p2927_p3 = pnand %p2926_p2, %p2920_p13 }
  0x46   :  { %2930 = shalt.err (!%p2927_p3)
}
  0x47   :  { %67 = dma.hbm_to_vmem [thread:$0]  %s3633_s9, 16, %s65_s15, [#allocation6]  }
  0x48   :  { %s2931_s29 = scalar_lea.hbm %s3636_s12, 16 }
  0x49   :  { %p2932_p4 = scmp.ne.s32.totalorder %s3636_s12, %s2931_s29  ;;  %p2935_p5 = scmp.lt.u32.totalorder %s2931_s29, %s3636_s12 }
  0x4b   :  { %p2937_p6 = pnand %p2935_p5, %p2932_p4 }
  0x4d   :  { %2940 = shalt.err (!%p2937_p6)
}
  0x4e   :  { %s2941_s17 = scalar_lea.vmem %s87_s8, 16  ;;  %s2945_s19 = scalar_lea.vmem %s87_s8, 32 }
  0x4f   :  { %p2942_p7 = scmp.ne.s32.totalorder %s87_s8, %s2941_s17  ;;  %p2946_p8 = scmp.lt.s32.totalorder %s87_s8, %s87_s8 }
  0x50   :  { %p2947_p9 = scmp.lt.s32.totalorder %s2945_s19, %s2941_s17 }
  0x52   :  { %p2948_p10 = por %p2947_p9, %p2946_p8 }
  0x54   :  { %p2949_p11 = pnand %p2948_p10, %p2942_p7 }
  0x56   :  { %2952 = shalt.err (!%p2949_p11)
}
  0x57   :  { %89 = dma.hbm_to_vmem [thread:$0]  %s3636_s12, 16, %s87_s8, [#allocation9]  }
  0x58   :  { %2975 = dma.done.wait [#allocation3], 128  }
  0x59   :  { %2976 = vsyncadd [#allocation3], 4294967168 }
  0x5a   :  { %2977 = dma.done.wait [#allocation6], 32  }
  0x5b   :  { %2978 = vsyncadd [#allocation6], 4294967264 }
  0x5c   :  { %2979 = dma.done.wait [#allocation9], 32  }
  0x5d   :  { %2980 = vsyncadd [#allocation9], 4294967264  ;;  %v2698_v0 = vld [vmem:[#allocation2] sm:$0xff]   ;;  %v2700_v2 = vld [vmem:[%s3624_s0 + $0x8] sm:$0xff]   ;;  %vm160_vm0 = vcmask 130048   ;;  %v2990_v25 = vmov 0.0  }
  0x5e   :  { %2397 = vmatprep.subr.bf16.mxu0 %v2698_v0  ;;  %v2699_v1 = vld [vmem:[%s3624_s0] sm:$0xff]   ;;  %v2701_v4 = vld [vmem:[%s3624_s0 + $0x10] sm:$0xff]   ;;  %v2702_v5 = vld [vmem:[%s3624_s0 + $0x18] sm:$0xff]   ;;  %2403 = vmatprep.subr.bf16.mxu1 %v2990_v25  ;;  %vm2991_vm1 = vmmov 0   ;;  %vm262_vm2 = vcmask 261120   ;;  %vm2081_vm3 = vcmask 257024  }
  0x5f   :  { %2398 = vmatpush3.bf16.msra.mxu0 %v2698_v0  ;;  %v146_v3 = vpack.c.bf16 %v2700_v2, %v2699_v1  ;;  %v147_v6 = vpack.c.bf16 %v2702_v5, %v2701_v4  ;;  %v2237_v7 = vld [vmem:[%s3627_s3] ss:$0 sm:$0xff]  ;;  %v3170_v26 = vld [vmem:[%s3626_s2 + $0x8] sm:$0xff]   ;;  %2407 = vmatprep.mubr.msk.bf16.mxu1 %vm2991_vm1, %v2990_v25 }
  0x60   :  { %v3156_v23 = vld [vmem:[%s3626_s2] sm:$0xff]   ;;  %2411 = vmatprep.subr.bf16.mxu0 %v2990_v25  ;;  %v3175_v27 = vld [vmem:[%s3628_s4 + $0x8] sm:$0xff]   ;;  %s2992_s2 = smov 96  }
  0x61   :  { %2399 = vmatprep.mubr.msk.bf16.mxu0 %vm160_vm0, %v146_v3  ;;  %v3161_v24 = vld [vmem:[%s3628_s4] sm:$0xff]   ;;  %2404 = vmatpush3.bf16.msra.mxu1 %v3156_v23  ;;  %s2993_s4 = smov 32  }
  0x62   :  { %2400 = vmatmul.mubr.msk.bf16.vlgmr.msra.gmra.mrb[0].mxu0 %vm160_vm0, %v147_v6  ;;  %2405 = vmatprep.subr.bf16.mxu1 %v2990_v25  ;;  %v3207_v33 = vld [vmem:[%s3630_s6] ss:$0 sm:$0xff] }
  0x63   :  { %2412 = vmatpush3.bf16.msra.mxu0 %v3161_v24  ;;  %2415 = vmatprep.mubr.msk.bf16.mxu0 %vm2991_vm1, %v2990_v25 }
  0x64   :  { %2413 = vmatprep.subr.bf16.mxu0 %v2990_v25 }
  0x65   :  { %2406 = vmatpush3.bf16.msra.mxu1 %v3170_v26 }
  0x66   :  { %2419 = vmatprep.subr.bf16.mxu1 %v2990_v25 }
  0x67   :  { %2414 = vmatpush3.bf16.msra.mxu0 %v3175_v27 }
  0x68   :  { %2427 = vmatprep.subr.bf16.mxu0 %v2990_v25 }
 0x135   :  { %v2401_v8 = vpop.f32.mrb[0].mxu0 }
 0x136   :  { %v3142_v9 = vadd.f32 %v2401_v8, %v2237_v7  ;;  %v201_v10 = vpop.f32.mrb[1].mxu0 }
 0x137   :  { %v3144_v11 = vadd.f32 %v2237_v7, %v201_v10  ;;  %v2402_v12 = vpop.f32.mrb[2].mxu0  ;;  %v3237_v10 = vld [vmem:[%s3629_s5 + $0x8] sm:$0xff]  }
 0x138   :  { %v3146_v13 = vadd.f32 %v2402_v12, %v2237_v7  ;;  %v204_v14 = vpop.f32.mrb[3].mxu0 }
 0x139   :  { %v3148_v15 = vadd.f32 %v2237_v7, %v204_v14  ;;  %2713 = vtanh.f32 %v3144_v11  ;;  %v2241_v17 = vmul.f32 -1.442695, %v3144_v11  ;;  %v220_v34 = vcombine.high %v3144_v11, %v3144_v11  ;;  %v3229_v7 = vld [vmem:[%s3629_s5] sm:$0xff]  }
 0x13b   :  { %2715 = vpow2.f32 %v2241_v17 }
 0x143   :  { %v2714_v16 = vpop.eup %2713 }
 0x144   :  { %236 = vrot.lane.b32.xlu0 %v2714_v16, %s2986_s10 }
 0x145   :  { %v2716_v18 = vpop.eup %2715 }
 0x146   :  { %v231_v19 = vadd.f32 1.0, %v2716_v18 }
 0x148   :  { %2717 = vrcp.f32 %v231_v19 }
 0x152   :  { %v2718_v20 = vpop.eup %2717 }
 0x1b6   :  { %v237_v21 = vpop.permute.xlu0 %236 }
 0x1b7   :  { %v239_v22 = vmul.f32 %v2718_v20, %v237_v21 }
 0x1b9   :  { %2719 = vtanh.f32 %v239_v22 }
 0x1c3   :  { %v2720_v28 = vpop.eup %2719 }
 0x1c4   :  { %242 = vrot.lane.b32.xlu0 %v2720_v28, %s2992_s2 }
 0x1c8   :  { %315 = vrot.lane.b32.xlu0 %v239_v22, %s2993_s4 }
 0x236   :  { %v243_v29 = vpop.permute.xlu0 %242 }
 0x237   :  { %v245_v30 = vmul.f32 %v2718_v20, %v243_v29 }
 0x239   :  { %v246_v31 = vpack.c.bf16 %v245_v30, %v245_v30 }
 0x23a   :  { %v316_v53 = vpop.permute.xlu0 %315 }
 0x23b   :  { %248 = vrot.lane.b32.xlu1 %v246_v31, %s2993_s4 }
 0x2ad   :  { %v249_v32 = vpop.permute.xlu1 %248 }
 0x2ae   :  { %2408 = vmatmul.mubr.msk.bf16.vlgmr.msra.gmra.mrb[0].mxu1 %vm262_vm2, %v249_v32  ;;  %2416 = vmatmul.mubr.msk.bf16.vlgmr.msra.gmra.mrb[4].mxu0 %vm262_vm2, %v249_v32 }
 0x2af   :  { %2420 = vmatpush3.bf16.msra.mxu1 %v3156_v23  ;;  %2428 = vmatpush3.bf16.msra.mxu0 %v3161_v24 }
 0x2b0   :  { %2421 = vmatprep.subr.bf16.mxu1 %v2990_v25  ;;  %2429 = vmatprep.subr.bf16.mxu0 %v2990_v25 }
 0x2b1   :  { %2423 = vmatprep.mubr.msk.bf16.mxu1 %vm2991_vm1, %v2990_v25  ;;  %2431 = vmatprep.mubr.msk.bf16.mxu0 %vm2991_vm1, %v2990_v25 }
 0x2b3   :  { %2422 = vmatpush3.bf16.msra.mxu1 %v3170_v26  ;;  %2430 = vmatpush3.bf16.msra.mxu0 %v3175_v27 }
 0x2b4   :  { %2435 = vmatprep.subr.bf16.mxu0 %v2990_v25  ;;  %2443 = vmatprep.subr.bf16.mxu1 %v2990_v25 }
 0x381   :  { %v300_v35 = vpop.f32.mrb[0].mxu1  ;;  %v387_v36 = vpop.f32.mrb[4].mxu0 }
 0x382   :  { %v306_v37 = vadd.f32 %v300_v35, %v220_v34  ;;  %v388_v38 = vadd.f32 %v3207_v33, %v387_v36  ;;  %v2409_v39 = vpop.f32.mrb[1].mxu1  ;;  %v2417_v40 = vpop.f32.mrb[5].mxu0 }
 0x383   :  { %v303_v41 = vpop.f32.mrb[2].mxu1  ;;  %v390_v42 = vpop.f32.mrb[6].mxu0 }
 0x384   :  { %2721 = vtanh.f32 %v306_v37  ;;  %v2410_v43 = vpop.f32.mrb[3].mxu1  ;;  %v2418_v44 = vpop.f32.mrb[7].mxu0  ;;  %v2245_v47 = vmul.f32 -1.442695, %v306_v37  ;;  %v2250_v48 = vmul.f32 -1.442695, %v388_v38 }
 0x385   :  { %2723 = vtanh.f32 %v388_v38 }
 0x386   :  { %2725 = vpow2.f32 %v2245_v47 }
 0x387   :  { %2727 = vpow2.f32 %v2250_v48 }
 0x38e   :  { %v2722_v45 = vpop.eup %2721 }
 0x38f   :  { %v2724_v46 = vpop.eup %2723  ;;  %320 = vrot.lane.b32.xlu1 %v2722_v45, %s2986_s10 }
 0x390   :  { %401 = vrot.lane.b32.xlu0 %v2724_v46, %s2986_s10  ;;  %v2726_v49 = vpop.eup %2725 }
 0x391   :  { %v2728_v50 = vpop.eup %2727  ;;  %v310_v51 = vadd.f32 1.0, %v2726_v49 }
 0x392   :  { %v396_v52 = vadd.f32 1.0, %v2728_v50 }
 0x393   :  { %2729 = vrcp.f32 %v310_v51 }
 0x394   :  { %2731 = vrcp.f32 %v396_v52 }
 0x39d   :  { %v2730_v54 = vpop.eup %2729 }
 0x39e   :  { %v2732_v56 = vpop.eup %2731  ;;  %v318_v61 = vmul.f32 %v2730_v54, %v316_v53 }
 0x401   :  { %v321_v55 = vpop.permute.xlu1 %320 }
 0x402   :  { %v402_v57 = vpop.permute.xlu0 %401  ;;  %v323_v58 = vmul.f32 %v2730_v54, %v321_v55 }
 0x403   :  { %v404_v59 = vmul.f32 %v2732_v56, %v402_v57 }
 0x404   :  { %325 = vrot.lane.b32.xlu1 %v323_v58, %s2993_s4 }
 0x405   :  { %2733 = vtanh.f32 %v404_v59 }
 0x40f   :  { %v2734_v60 = vpop.eup %2733 }
 0x410   :  { %407 = vrot.lane.b32.xlu0 %v2734_v60, %s2992_s2 }
 0x476   :  { %v326_v62 = vpop.permute.xlu1 %325 }
 0x477   :  { %v3216_v63 = vadd.f32 %v326_v62, %v318_v61  ;;  %v221_v61 = vcombine.high %v3148_v15, %v3148_v15 }
 0x479   :  { %2735 = vtanh.f32 %v3216_v63 }
 0x482   :  { %v408_v0 = vpop.permute.xlu0 %407 }
 0x483   :  { %v2736_v1 = vpop.eup %2735  ;;  %v3219_v2 = vmul.f32 %v2732_v56, %v408_v0 }
 0x484   :  { %331 = vrot.lane.b32.xlu1 %v2736_v1, %s2986_s10 }
 0x485   :  { %v523_v3 = vpack.c.bf16 %v3219_v2, %v3219_v2 }
 0x487   :  { %525 = vrot.lane.b32.xlu0 %v523_v3, %s2993_s4 }
 0x4f6   :  { %v332_v4 = vpop.permute.xlu1 %331 }
 0x4f7   :  { %v334_v5 = vmul.f32 %v2730_v54, %v332_v4 }
 0x4f9   :  { %v411_v6 = vpack.c.bf16 %v334_v5, %v334_v5  ;;  %v526_v11 = vpop.permute.xlu0 %525 }
 0x4fb   :  { %413 = vrot.lane.b32.xlu1 %v411_v6, %s2993_s4 }
 0x56d   :  { %v414_v8 = vpop.permute.xlu1 %413 }
 0x56e   :  { %2424 = vmatmul.mubr.msk.bf16.vlgmr.msra.gmra.mrb[4].mxu1 %vm262_vm2, %v414_v8  ;;  %2432 = vmatmul.mubr.msk.bf16.vlgmr.msra.gmra.mrb[8].mxu0 %vm262_vm2, %v414_v8 }
 0x56f   :  { %2436 = vmatpush3.bf16.msra.mxu0 %v3229_v7  ;;  %2439 = vmatprep.mubr.msk.bf16.mxu0 %vm2991_vm1, %v2990_v25 }
 0x570   :  { %2437 = vmatprep.subr.bf16.mxu0 %v2990_v25  ;;  %2444 = vmatpush3.bf16.msra.mxu1 %v3156_v23 }
 0x571   :  { %2445 = vmatprep.subr.bf16.mxu1 %v2990_v25  ;;  %2447 = vmatprep.mubr.msk.bf16.mxu1 %vm2991_vm1, %v2990_v25 }
 0x573   :  { %2438 = vmatpush3.bf16.msra.mxu0 %v3237_v10 }
 0x574   :  { %2446 = vmatpush3.bf16.msra.mxu1 %v3170_v26  ;;  %2467 = vmatprep.subr.bf16.mxu0 %v2990_v25 }
 0x575   :  { %2451 = vmatprep.subr.bf16.mxu1 %v2990_v25 }
 0x57a   :  { %2440 = vmatmul.mubr.msk.bf16.vlgmr.msra.gmra.mrb[8].mxu0 %vm262_vm2, %v526_v11 }
 0x57b   :  { %2468 = vmatpush3.bf16.msra.mxu0 %v3156_v23  ;;  %2471 = vmatprep.mubr.msk.bf16.mxu0 %vm2991_vm1, %v2990_v25 }
 0x57c   :  { %2469 = vmatprep.subr.bf16.mxu0 %v2990_v25 }
 0x57f   :  { %2470 = vmatpush3.bf16.msra.mxu0 %v3170_v26 }
 0x580   :  { %2475 = vmatprep.subr.bf16.mxu0 %v2990_v25 }
 0x641   :  { %v452_v12 = vpop.f32.mrb[4].mxu1 }
 0x642   :  { %v458_v14 = vadd.f32 %v452_v12, %v3148_v15  ;;  %v2425_v16 = vpop.f32.mrb[5].mxu1 }
 0x643   :  { %v455_v17 = vpop.f32.mrb[6].mxu1 }
 0x644   :  { %2737 = vtanh.f32 %v458_v14  ;;  %v2426_v18 = vpop.f32.mrb[7].mxu1  ;;  %v2252_v31 = vmul.f32 -1.442695, %v458_v14 }
 0x64d   :  { %v576_v19 = vpop.f32.mrb[8].mxu0 }
 0x64e   :  { %v2738_v20 = vpop.eup %2737  ;;  %v2651_v21 = vadd.f32 %v3207_v33, %v576_v19  ;;  %v2441_v22 = vpop.f32.mrb[9].mxu0 }
 0x64f   :  { %v579_v28 = vpop.f32.mrb[10].mxu0  ;;  %468 = vrot.lane.b32.xlu1 %v2738_v20, %s2986_s10 }
 0x650   :  { %2739 = vtanh.f32 %v2651_v21  ;;  %v2442_v29 = vpop.f32.mrb[11].mxu0  ;;  %v2257_v32 = vmul.f32 -1.442695, %v2651_v21 }
 0x651   :  { %2741 = vpow2.f32 %v2252_v31 }
 0x652   :  { %2743 = vpow2.f32 %v2257_v32 }
 0x65a   :  { %v2740_v30 = vpop.eup %2739 }
 0x65b   :  { %596 = vrot.lane.b32.xlu0 %v2740_v30, %s2986_s10  ;;  %v2742_v34 = vpop.eup %2741 }
 0x65c   :  { %v462_v35 = vadd.f32 1.0, %v2742_v34  ;;  %v2744_v36 = vpop.eup %2743 }
 0x65d   :  { %v586_v37 = vadd.f32 1.0, %v2744_v36 }
 0x65e   :  { %2745 = vrcp.f32 %v462_v35 }
 0x65f   :  { %591 = vrot.lane.b32.xlu0 %v404_v59, %s2993_s4  ;;  %2747 = vrcp.f32 %v586_v37 }
 0x668   :  { %v2746_v38 = vpop.eup %2745 }
 0x669   :  { %v2748_v41 = vpop.eup %2747  ;;  %v466_v44 = vmul.f32 %v2746_v38, %v3216_v63 }
 0x6c1   :  { %v469_v39 = vpop.permute.xlu1 %468 }
 0x6c2   :  { %v471_v40 = vmul.f32 %v2746_v38, %v469_v39 }
 0x6c4   :  { %473 = vrot.lane.b32.xlu1 %v471_v40, %s2993_s4 }
 0x6cd   :  { %v597_v42 = vpop.permute.xlu0 %596 }
 0x6ce   :  { %v599_v43 = vmul.f32 %v2748_v41, %v597_v42 }
 0x6d0   :  { %601 = vrot.lane.b32.xlu1 %v599_v43, %s2993_s4 }
 0x6d1   :  { %v592_v47 = vpop.permute.xlu0 %591 }
 0x6d2   :  { %v594_v48 = vmul.f32 %v2748_v41, %v592_v47 }
 0x736   :  { %v474_v45 = vpop.permute.xlu1 %473 }
 0x737   :  { %v3265_v46 = vadd.f32 %v474_v45, %v466_v44 }
 0x739   :  { %2749 = vtanh.f32 %v3265_v46 }
 0x742   :  { %v602_v49 = vpop.permute.xlu1 %601 }
 0x743   :  { %v2750_v50 = vpop.eup %2749  ;;  %v3268_v51 = vadd.f32 %v602_v49, %v594_v48 }
 0x744   :  { %479 = vrot.lane.b32.xlu0 %v2750_v50, %s2986_s10 }
 0x745   :  { %2751 = vtanh.f32 %v3268_v51 }
 0x74f   :  { %v2752_v52 = vpop.eup %2751 }
 0x750   :  { %607 = vrot.lane.b32.xlu1 %v2752_v52, %s2986_s10 }
 0x7b6   :  { %v480_v53 = vpop.permute.xlu0 %479 }
 0x7b7   :  { %v482_v54 = vmul.f32 %v2746_v38, %v480_v53 }
 0x7b9   :  { %v611_v55 = vpack.c.bf16 %v482_v54, %v482_v54 }
 0x7bb   :  { %613 = vrot.lane.b32.xlu0 %v611_v55, %s2993_s4 }
 0x7c2   :  { %v608_v56 = vpop.permute.xlu1 %607 }
 0x7c3   :  { %v3274_v57 = vmul.f32 %v2748_v41, %v608_v56 }
 0x7c5   :  { %v723_v58 = vpack.c.bf16 %v3274_v57, %v3274_v57 }
 0x7c7   :  { %725 = vrot.lane.b32.xlu1 %v723_v58, %s2993_s4 }
 0x82d   :  { %v614_v59 = vpop.permute.xlu0 %613 }
 0x82e   :  { %2448 = vmatmul.mubr.msk.bf16.vlgmr.msra.gmra.mrb[8].mxu1 %vm262_vm2, %v614_v59 }
 0x82f   :  { %2452 = vmatpush3.bf16.msra.mxu1 %v3161_v24  ;;  %2455 = vmatprep.mubr.msk.bf16.mxu1 %vm2991_vm1, %v2990_v25 }
 0x830   :  { %2453 = vmatprep.subr.bf16.mxu1 %v2990_v25 }
 0x833   :  { %2454 = vmatpush3.bf16.msra.mxu1 %v3175_v27 }
 0x834   :  { %2459 = vmatprep.subr.bf16.mxu1 %v2990_v25 }
 0x836   :  { %2456 = vmatmul.mubr.msk.bf16.vlgmr.msra.gmra.mrb[12].mxu1 %vm262_vm2, %v614_v59 }
 0x837   :  { %2460 = vmatpush3.bf16.msra.mxu1 %v3229_v7  ;;  %2463 = vmatprep.mubr.msk.bf16.mxu1 %vm2991_vm1, %v2990_v25 }
 0x838   :  { %2461 = vmatprep.subr.bf16.mxu1 %v2990_v25 }
 0x839   :  { %v726_v60 = vpop.permute.xlu1 %725 }
 0x83b   :  { %2462 = vmatpush3.bf16.msra.mxu1 %v3237_v10 }
 0x83c   :  { %2491 = vmatprep.subr.bf16.mxu1 %v2990_v25 }
 0x842   :  { %2464 = vmatmul.mubr.msk.bf16.vlgmr.msra.gmra.mrb[12].mxu1 %vm262_vm2, %v726_v60 }
 0x843   :  { %2492 = vmatpush3.bf16.msra.mxu1 %v3156_v23  ;;  %2495 = vmatprep.mubr.msk.bf16.mxu1 %vm2991_vm1, %v2990_v25 }
 0x844   :  { %2493 = vmatprep.subr.bf16.mxu1 %v2990_v25 }
 0x847   :  { %2494 = vmatpush3.bf16.msra.mxu1 %v3170_v26 }
 0x848   :  { %2499 = vmatprep.subr.bf16.mxu1 %v2990_v25 }
 0x901   :  { %v652_v62 = vpop.f32.mrb[8].mxu1 }
 0x902   :  { %v658_v63 = vadd.f32 %v652_v62, %v221_v61  ;;  %v2449_v0 = vpop.f32.mrb[9].mxu1 }
 0x903   :  { %v655_v1 = vpop.f32.mrb[10].mxu1 }
 0x904   :  { %2753 = vtanh.f32 %v658_v63  ;;  %v2450_v3 = vpop.f32.mrb[11].mxu1  ;;  %v2259_v15 = vmul.f32 -1.442695, %v658_v63 }
 0x90e   :  { %v2754_v4 = vpop.eup %2753 }
 0x90f   :  { %668 = vrot.lane.b32.xlu0 %v2754_v4, %s2986_s10 }
 0x915   :  { %v764_v5 = vpop.f32.mrb[12].mxu1 }
 0x916   :  { %v2652_v6 = vadd.f32 %v3207_v33, %v764_v5  ;;  %v2465_v8 = vpop.f32.mrb[13].mxu1 }
 0x917   :  { %v767_v11 = vpop.f32.mrb[14].mxu1 }
 0x918   :  { %2755 = vtanh.f32 %v2652_v6  ;;  %v2466_v12 = vpop.f32.mrb[15].mxu1  ;;  %v2262_v18 = vmul.f32 -1.442695, %v2652_v6 }
 0x919   :  { %2757 = vpow2.f32 %v2259_v15 }
 0x922   :  { %v2756_v14 = vpop.eup %2755 }
 0x923   :  { %780 = vrot.lane.b32.xlu1 %v2756_v14, %s2986_s10  ;;  %v2758_v16 = vpop.eup %2757 }
 0x924   :  { %v662_v17 = vadd.f32 1.0, %v2758_v16 }
 0x926   :  { %2759 = vrcp.f32 %v662_v17 }
 0x927   :  { %2761 = vpow2.f32 %v2262_v18 }
 0x930   :  { %v2760_v19 = vpop.eup %2759 }
 0x931   :  { %v2762_v22 = vpop.eup %2761  ;;  %v666_v32 = vmul.f32 %v2760_v19, %v3265_v46 }
 0x932   :  { %v774_v28 = vadd.f32 1.0, %v2762_v22 }
 0x934   :  { %2763 = vrcp.f32 %v774_v28 }
 0x93e   :  { %v2764_v29 = vpop.eup %2763 }
 0x93f   :  { %v778_v37 = vmul.f32 %v2764_v29, %v3268_v51 }
 0x981   :  { %v669_v20 = vpop.permute.xlu0 %668 }
 0x982   :  { %v671_v21 = vmul.f32 %v2760_v19, %v669_v20 }
 0x984   :  { %673 = vrot.lane.b32.xlu0 %v671_v21, %s2993_s4 }
 0x995   :  { %v781_v30 = vpop.permute.xlu1 %780 }
 0x996   :  { %v783_v31 = vmul.f32 %v2764_v29, %v781_v30 }
 0x998   :  { %785 = vrot.lane.b32.xlu1 %v783_v31, %s2993_s4 }
 0x9f6   :  { %v674_v34 = vpop.permute.xlu0 %673 }
 0x9f7   :  { %v3308_v35 = vadd.f32 %v674_v34, %v666_v32 }
 0x9f9   :  { %2765 = vtanh.f32 %v3308_v35 }
 0xa03   :  { %v2766_v36 = vpop.eup %2765 }
 0xa04   :  { %679 = vrot.lane.b32.xlu0 %v2766_v36, %s2986_s10 }
 0xa0a   :  { %v786_v38 = vpop.permute.xlu1 %785 }
 0xa0b   :  { %v3313_v39 = vadd.f32 %v786_v38, %v778_v37  ;;  %v222_v37 = vcombine.high %v3142_v9, %v3142_v9 }
 0xa0d   :  { %2767 = vtanh.f32 %v3313_v39 }
 0xa17   :  { %v2768_v40 = vpop.eup %2767 }
 0xa18   :  { %791 = vrot.lane.b32.xlu1 %v2768_v40, %s2986_s10 }
 0xa76   :  { %v680_v41 = vpop.permute.xlu0 %679 }
 0xa77   :  { %v682_v42 = vmul.f32 %v2760_v19, %v680_v41 }
 0xa79   :  { %v795_v43 = vpack.c.bf16 %v682_v42, %v682_v42 }
 0xa7b   :  { %797 = vrot.lane.b32.xlu0 %v795_v43, %s2993_s4 }
 0xa8a   :  { %v792_v44 = vpop.permute.xlu1 %791 }
 0xa8b   :  { %v3318_v45 = vmul.f32 %v2764_v29, %v792_v44 }
 0xa8d   :  { %v907_v46 = vpack.c.bf16 %v3318_v45, %v3318_v45 }
 0xa8f   :  { %909 = vrot.lane.b32.xlu1 %v907_v46, %s2993_s4 }
 0xaed   :  { %v798_v47 = vpop.permute.xlu0 %797 }
 0xaee   :  { %2472 = vmatmul.mubr.msk.bf16.vlgmr.msra.gmra.mrb[12].mxu0 %vm262_vm2, %v798_v47 }
 0xaef   :  { %2476 = vmatpush3.bf16.msra.mxu0 %v3161_v24  ;;  %2479 = vmatprep.mubr.msk.bf16.mxu0 %vm2991_vm1, %v2990_v25 }
 0xaf0   :  { %2477 = vmatprep.subr.bf16.mxu0 %v2990_v25 }
 0xaf3   :  { %2478 = vmatpush3.bf16.msra.mxu0 %v3175_v27 }
 0xaf4   :  { %2483 = vmatprep.subr.bf16.mxu0 %v2990_v25 }
 0xaf6   :  { %2480 = vmatmul.mubr.msk.bf16.vlgmr.msra.gmra.mrb[16].mxu0 %vm262_vm2, %v798_v47 }
 0xaf7   :  { %2484 = vmatpush3.bf16.msra.mxu0 %v3229_v7  ;;  %2487 = vmatprep.mubr.msk.bf16.mxu0 %vm2991_vm1, %v2990_v25 }
 0xaf8   :  { %2485 = vmatprep.subr.bf16.mxu0 %v2990_v25 }
 0xafb   :  { %2486 = vmatpush3.bf16.msra.mxu0 %v3237_v10 }
 0xafc   :  { %2515 = vmatprep.subr.bf16.mxu0 %v2990_v25 }
 0xb01   :  { %v910_v48 = vpop.permute.xlu1 %909 }
 0xb02   :  { %2488 = vmatmul.mubr.msk.bf16.vlgmr.msra.gmra.mrb[16].mxu0 %vm262_vm2, %v910_v48 }
 0xb03   :  { %2516 = vmatpush3.bf16.msra.mxu0 %v3156_v23  ;;  %2519 = vmatprep.mubr.msk.bf16.mxu0 %vm2991_vm1, %v2990_v25 }
 0xb04   :  { %2517 = vmatprep.subr.bf16.mxu0 %v2990_v25 }
 0xb07   :  { %2518 = vmatpush3.bf16.msra.mxu0 %v3170_v26 }
 0xb08   :  { %2523 = vmatprep.subr.bf16.mxu0 %v2990_v25 }
 0xbc1   :  { %v836_v49 = vpop.f32.mrb[12].mxu0 }
 0xbc2   :  { %v842_v50 = vadd.f32 %v836_v49, %v3142_v9  ;;  %v2473_v51 = vpop.f32.mrb[13].mxu0 }
 0xbc3   :  { %v839_v52 = vpop.f32.mrb[14].mxu0 }
 0xbc4   :  { %2769 = vtanh.f32 %v842_v50  ;;  %v2474_v53 = vpop.f32.mrb[15].mxu0  ;;  %v2264_v62 = vmul.f32 -1.442695, %v842_v50 }
 0xbce   :  { %v2770_v54 = vpop.eup %2769 }
 0xbcf   :  { %852 = vrot.lane.b32.xlu0 %v2770_v54, %s2986_s10 }
 0xbd5   :  { %v948_v55 = vpop.f32.mrb[16].mxu0 }
 0xbd6   :  { %v2653_v56 = vadd.f32 %v3207_v33, %v948_v55  ;;  %v2489_v58 = vpop.f32.mrb[17].mxu0 }
 0xbd7   :  { %v951_v59 = vpop.f32.mrb[18].mxu0 }
 0xbd8   :  { %2771 = vtanh.f32 %v2653_v56  ;;  %v2490_v60 = vpop.f32.mrb[19].mxu0  ;;  %v2267_v1 = vmul.f32 -1.442695, %v2653_v56 }
 0xbd9   :  { %2773 = vpow2.f32 %v2264_v62 }
 0xbe2   :  { %v2772_v61 = vpop.eup %2771 }
 0xbe3   :  { %964 = vrot.lane.b32.xlu1 %v2772_v61, %s2986_s10  ;;  %v2774_v63 = vpop.eup %2773 }
 0xbe4   :  { %v846_v0 = vadd.f32 1.0, %v2774_v63 }
 0xbe6   :  { %2775 = vrcp.f32 %v846_v0 }
 0xbe7   :  { %2777 = vpow2.f32 %v2267_v1 }
 0xbf0   :  { %v2776_v3 = vpop.eup %2775 }
 0xbf1   :  { %v2778_v6 = vpop.eup %2777  ;;  %v850_v15 = vmul.f32 %v2776_v3, %v3308_v35 }
 0xbf2   :  { %v958_v8 = vadd.f32 1.0, %v2778_v6 }
 0xbf4   :  { %2779 = vrcp.f32 %v958_v8 }
 0xbfe   :  { %v2780_v11 = vpop.eup %2779 }
 0xbff   :  { %v962_v19 = vmul.f32 %v2780_v11, %v3313_v39 }
 0xc41   :  { %v853_v4 = vpop.permute.xlu0 %852 }
 0xc42   :  { %v855_v5 = vmul.f32 %v2776_v3, %v853_v4 }
 0xc44   :  { %857 = vrot.lane.b32.xlu0 %v855_v5, %s2993_s4 }
 0xc55   :  { %v965_v12 = vpop.permute.xlu1 %964 }
 0xc56   :  { %v967_v14 = vmul.f32 %v2780_v11, %v965_v12 }
 0xc58   :  { %969 = vrot.lane.b32.xlu1 %v967_v14, %s2993_s4 }
 0xcb6   :  { %v858_v16 = vpop.permute.xlu0 %857 }
 0xcb7   :  { %v3351_v17 = vadd.f32 %v858_v16, %v850_v15 }
 0xcb9   :  { %2781 = vtanh.f32 %v3351_v17 }
 0xcc3   :  { %v2782_v18 = vpop.eup %2781 }
 0xcc4   :  { %863 = vrot.lane.b32.xlu0 %v2782_v18, %s2986_s10 }
 0xcca   :  { %v970_v20 = vpop.permute.xlu1 %969 }
 0xccb   :  { %v3356_v21 = vadd.f32 %v970_v20, %v962_v19 }
 0xccd   :  { %2783 = vtanh.f32 %v3356_v21 }
 0xcd7   :  { %v2784_v22 = vpop.eup %2783 }
 0xcd8   :  { %975 = vrot.lane.b32.xlu1 %v2784_v22, %s2986_s10 }
 0xd36   :  { %v864_v28 = vpop.permute.xlu0 %863 }
 0xd37   :  { %v866_v29 = vmul.f32 %v2776_v3, %v864_v28 }
 0xd39   :  { %v979_v30 = vpack.c.bf16 %v866_v29, %v866_v29 }
 0xd3b   :  { %981 = vrot.lane.b32.xlu0 %v979_v30, %s2993_s4 }
 0xd4a   :  { %v976_v31 = vpop.permute.xlu1 %975 }
 0xd4b   :  { %v3361_v32 = vmul.f32 %v2780_v11, %v976_v31 }
 0xd4d   :  { %v1091_v34 = vpack.c.bf16 %v3361_v32, %v3361_v32 }
 0xd4f   :  { %1093 = vrot.lane.b32.xlu1 %v1091_v34, %s2993_s4 }
 0xdad   :  { %v982_v35 = vpop.permute.xlu0 %981 }
 0xdae   :  { %2496 = vmatmul.mubr.msk.bf16.vlgmr.msra.gmra.mrb[16].mxu1 %vm262_vm2, %v982_v35 }
 0xdaf   :  { %2500 = vmatpush3.bf16.msra.mxu1 %v3161_v24  ;;  %2503 = vmatprep.mubr.msk.bf16.mxu1 %vm2991_vm1, %v2990_v25 }
 0xdb0   :  { %2501 = vmatprep.subr.bf16.mxu1 %v2990_v25 }
 0xdb3   :  { %2502 = vmatpush3.bf16.msra.mxu1 %v3175_v27 }
 0xdb4   :  { %2507 = vmatprep.subr.bf16.mxu1 %v2990_v25 }
 0xdb6   :  { %2504 = vmatmul.mubr.msk.bf16.vlgmr.msra.gmra.mrb[20].mxu1 %vm262_vm2, %v982_v35 }
 0xdb7   :  { %2508 = vmatpush3.bf16.msra.mxu1 %v3229_v7  ;;  %2511 = vmatprep.mubr.msk.bf16.mxu1 %vm2991_vm1, %v2990_v25 }
 0xdb8   :  { %2509 = vmatprep.subr.bf16.mxu1 %v2990_v25 }
 0xdbb   :  { %2510 = vmatpush3.bf16.msra.mxu1 %v3237_v10 }
 0xdbc   :  { %2539 = vmatprep.subr.bf16.mxu1 %v2990_v25 }
 0xdc1   :  { %v1094_v36 = vpop.permute.xlu1 %1093 }
 0xdc2   :  { %2512 = vmatmul.mubr.msk.bf16.vlgmr.msra.gmra.mrb[20].mxu1 %vm262_vm2, %v1094_v36 }
 0xdc3   :  { %2540 = vmatpush3.bf16.msra.mxu1 %v3156_v23  ;;  %2543 = vmatprep.mubr.msk.bf16.mxu1 %vm2991_vm1, %v2990_v25 }
 0xdc4   :  { %2541 = vmatprep.subr.bf16.mxu1 %v2990_v25 }
 0xdc7   :  { %2542 = vmatpush3.bf16.msra.mxu1 %v3170_v26 }
 0xdc8   :  { %2547 = vmatprep.subr.bf16.mxu1 %v2990_v25 }
 0xe81   :  { %v1020_v38 = vpop.f32.mrb[16].mxu1 }
 0xe82   :  { %v1026_v39 = vadd.f32 %v1020_v38, %v222_v37  ;;  %v2497_v40 = vpop.f32.mrb[17].mxu1 }
 0xe83   :  { %v1023_v41 = vpop.f32.mrb[18].mxu1 }
 0xe84   :  { %2785 = vtanh.f32 %v1026_v39  ;;  %v2498_v42 = vpop.f32.mrb[19].mxu1  ;;  %v2269_v9 = vmul.f32 -1.442695, %v1026_v39 }
 0xe8e   :  { %v2786_v43 = vpop.eup %2785 }
 0xe8f   :  { %1036 = vrot.lane.b32.xlu0 %v2786_v43, %s2986_s10 }
 0xe95   :  { %v1132_v23 = vpop.f32.mrb[20].mxu1 }
 0xe96   :  { %v2654_v44 = vadd.f32 %v3207_v33, %v1132_v23  ;;  %v2513_v46 = vpop.f32.mrb[21].mxu1 }
 0xe97   :  { %v1135_v47 = vpop.f32.mrb[22].mxu1 }
 0xe98   :  { %2787 = vtanh.f32 %v2654_v44  ;;  %v2514_v26 = vpop.f32.mrb[23].mxu1  ;;  %v2272_v51 = vmul.f32 -1.442695, %v2654_v44 }
 0xe99   :  { %2789 = vpow2.f32 %v2269_v9 }
 0xea2   :  { %v2788_v48 = vpop.eup %2787 }
 0xea3   :  { %1148 = vrot.lane.b32.xlu1 %v2788_v48, %s2986_s10  ;;  %v2790_v49 = vpop.eup %2789 }
 0xea4   :  { %v1030_v50 = vadd.f32 1.0, %v2790_v49 }
 0xea6   :  { %2791 = vrcp.f32 %v1030_v50 }
 0xea7   :  { %2793 = vpow2.f32 %v2272_v51 }
 0xeb0   :  { %v2792_v52 = vpop.eup %2791 }
 0xeb1   :  { %v2794_v55 = vpop.eup %2793  ;;  %v1034_v61 = vmul.f32 %v2792_v52, %v3351_v17 }
 0xeb2   :  { %v1142_v56 = vadd.f32 1.0, %v2794_v55 }
 0xeb4   :  { %2795 = vrcp.f32 %v1142_v56 }
 0xebe   :  { %v2796_v58 = vpop.eup %2795 }
 0xebf   :  { %v1146_v1 = vmul.f32 %v2796_v58, %v3356_v21 }
 0xf01   :  { %v1037_v53 = vpop.permute.xlu0 %1036 }
 0xf02   :  { %v1039_v54 = vmul.f32 %v2792_v52, %v1037_v53 }
 0xf04   :  { %1041 = vrot.lane.b32.xlu0 %v1039_v54, %s2993_s4 }
 0xf15   :  { %v1149_v59 = vpop.permute.xlu1 %1148 }
 0xf16   :  { %v1151_v60 = vmul.f32 %v2796_v58, %v1149_v59 }
 0xf18   :  { %1153 = vrot.lane.b32.xlu1 %v1151_v60, %s2993_s4 }
 0xf76   :  { %v1042_v62 = vpop.permute.xlu0 %1041 }
 0xf77   :  { %v3395_v63 = vadd.f32 %v1042_v62, %v1034_v61 }
 0xf79   :  { %2797 = vtanh.f32 %v3395_v63 }
 0xf83   :  { %v2798_v0 = vpop.eup %2797 }
 0xf84   :  { %1047 = vrot.lane.b32.xlu0 %v2798_v0, %s2986_s10 }
 0xf8a   :  { %v1154_v3 = vpop.permute.xlu1 %1153 }
 0xf8b   :  { %v3400_v4 = vadd.f32 %v1154_v3, %v1146_v1 }
 0xf8d   :  { %2799 = vtanh.f32 %v3400_v4 }
 0xf97   :  { %v2800_v5 = vpop.eup %2799 }
 0xf98   :  { %1159 = vrot.lane.b32.xlu1 %v2800_v5, %s2986_s10 }
 0xff6   :  { %v1048_v6 = vpop.permute.xlu0 %1047 }
 0xff7   :  { %v1050_v8 = vmul.f32 %v2792_v52, %v1048_v6 }
 0xff9   :  { %v1163_v11 = vpack.c.bf16 %v1050_v8, %v1050_v8 }
 0xffb   :  { %1165 = vrot.lane.b32.xlu0 %v1163_v11, %s2993_s4 }
0x100a   :  { %v1160_v12 = vpop.permute.xlu1 %1159 }
0x100b   :  { %v3405_v14 = vmul.f32 %v2796_v58, %v1160_v12 }
0x100d   :  { %v1275_v15 = vpack.c.bf16 %v3405_v14, %v3405_v14 }
0x100f   :  { %1277 = vrot.lane.b32.xlu1 %v1275_v15, %s2993_s4 }
0x106d   :  { %v1166_v16 = vpop.permute.xlu0 %1165 }
0x106e   :  { %2520 = vmatmul.mubr.msk.bf16.vlgmr.msra.gmra.mrb[20].mxu0 %vm262_vm2, %v1166_v16 }
0x106f   :  { %2524 = vmatpush3.bf16.msra.mxu0 %v3161_v24  ;;  %2527 = vmatprep.mubr.msk.bf16.mxu0 %vm2991_vm1, %v2990_v25 }
0x1070   :  { %2525 = vmatprep.subr.bf16.mxu0 %v2990_v25 }
0x1073   :  { %2526 = vmatpush3.bf16.msra.mxu0 %v3175_v27 }
0x1074   :  { %2531 = vmatprep.subr.bf16.mxu0 %v2990_v25 }
0x1076   :  { %2528 = vmatmul.mubr.msk.bf16.vlgmr.msra.gmra.mrb[24].mxu0 %vm262_vm2, %v1166_v16 }
0x1077   :  { %2532 = vmatpush3.bf16.msra.mxu0 %v3229_v7  ;;  %2535 = vmatprep.mubr.msk.bf16.mxu0 %vm2991_vm1, %v2990_v25 }
0x1078   :  { %2533 = vmatprep.subr.bf16.mxu0 %v2990_v25 }
0x107b   :  { %2534 = vmatpush3.bf16.msra.mxu0 %v3237_v10 }
0x107c   :  { %2563 = vmatprep.subr.bf16.mxu0 %v2990_v25 }
0x1081   :  { %v1278_v17 = vpop.permute.xlu1 %1277 }
0x1082   :  { %2536 = vmatmul.mubr.msk.bf16.vlgmr.msra.gmra.mrb[24].mxu0 %vm262_vm2, %v1278_v17 }
0x1083   :  { %2564 = vmatpush3.bf16.msra.mxu0 %v3161_v24  ;;  %2567 = vmatprep.mubr.msk.bf16.mxu0 %vm2991_vm1, %v2990_v25 }
0x1084   :  { %2565 = vmatprep.subr.bf16.mxu0 %v2990_v25 }
0x1087   :  { %2566 = vmatpush3.bf16.msra.mxu0 %v3175_v27 }
0x1088   :  { %2571 = vmatprep.subr.bf16.mxu0 %v2990_v25 }
0x1141   :  { %v1204_v18 = vpop.f32.mrb[20].mxu0 }
0x1142   :  { %v1210_v19 = vadd.f32 %v1204_v18, %v3146_v13  ;;  %v2521_v20 = vpop.f32.mrb[21].mxu0 }
0x1143   :  { %v1207_v21 = vpop.f32.mrb[22].mxu0 }
0x1144   :  { %2801 = vtanh.f32 %v1210_v19  ;;  %v2522_v22 = vpop.f32.mrb[23].mxu0  ;;  %v2274_v37 = vmul.f32 -1.442695, %v1210_v19 }
0x114e   :  { %v2802_v28 = vpop.eup %2801 }
0x114f   :  { %1220 = vrot.lane.b32.xlu0 %v2802_v28, %s2986_s10 }
0x1155   :  { %v1316_v29 = vpop.f32.mrb[24].mxu0 }
0x1156   :  { %v2655_v30 = vadd.f32 %v3207_v33, %v1316_v29  ;;  %v2537_v31 = vpop.f32.mrb[25].mxu0 }
0x1157   :  { %v1319_v34 = vpop.f32.mrb[26].mxu0 }
0x1158   :  { %2803 = vtanh.f32 %v2655_v30  ;;  %v2538_v35 = vpop.f32.mrb[27].mxu0  ;;  %v2277_v40 = vmul.f32 -1.442695, %v2655_v30 }
0x1159   :  { %2805 = vpow2.f32 %v2274_v37 }
0x1162   :  { %v2804_v36 = vpop.eup %2803 }
0x1163   :  { %1332 = vrot.lane.b32.xlu1 %v2804_v36, %s2986_s10  ;;  %v2806_v38 = vpop.eup %2805 }
0x1164   :  { %v1214_v39 = vadd.f32 1.0, %v2806_v38 }
0x1166   :  { %2807 = vrcp.f32 %v1214_v39 }
0x1167   :  { %2809 = vpow2.f32 %v2277_v40 }
0x1170   :  { %v2808_v41 = vpop.eup %2807 }
0x1171   :  { %v2810_v23 = vpop.eup %2809  ;;  %v1218_v48 = vmul.f32 %v2808_v41, %v3395_v63 }
0x1172   :  { %v1326_v44 = vadd.f32 1.0, %v2810_v23 }
0x1174   :  { %2811 = vrcp.f32 %v1326_v44 }
0x117e   :  { %v2812_v46 = vpop.eup %2811 }
0x117f   :  { %v1330_v51 = vmul.f32 %v2812_v46, %v3400_v4 }
0x11c1   :  { %v1221_v42 = vpop.permute.xlu0 %1220 }
0x11c2   :  { %v1223_v43 = vmul.f32 %v2808_v41, %v1221_v42 }
0x11c4   :  { %1225 = vrot.lane.b32.xlu0 %v1223_v43, %s2993_s4 }
0x11d5   :  { %v1333_v47 = vpop.permute.xlu1 %1332 }
0x11d6   :  { %v1335_v26 = vmul.f32 %v2812_v46, %v1333_v47 }
0x11d8   :  { %1337 = vrot.lane.b32.xlu1 %v1335_v26, %s2993_s4 }
0x1236   :  { %v1226_v9 = vpop.permute.xlu0 %1225 }
0x1237   :  { %v3438_v49 = vadd.f32 %v1226_v9, %v1218_v48 }
0x1239   :  { %2813 = vtanh.f32 %v3438_v49 }
0x1243   :  { %v2814_v50 = vpop.eup %2813 }
0x1244   :  { %1231 = vrot.lane.b32.xlu0 %v2814_v50, %s2986_s10 }
0x124a   :  { %v1338_v52 = vpop.permute.xlu1 %1337 }
0x124b   :  { %v3443_v53 = vadd.f32 %v1338_v52, %v1330_v51 }
0x124d   :  { %2815 = vtanh.f32 %v3443_v53 }
0x1257   :  { %v2816_v54 = vpop.eup %2815 }
0x1258   :  { %1343 = vrot.lane.b32.xlu1 %v2816_v54, %s2986_s10 }
0x12b6   :  { %v1232_v55 = vpop.permute.xlu0 %1231 }
0x12b7   :  { %v1234_v56 = vmul.f32 %v2808_v41, %v1232_v55 }
0x12b9   :  { %v1347_v58 = vpack.c.bf16 %v1234_v56, %v1234_v56  ;;  %v3507_v56 = vld [vmem:[%s3631_s7 + $0x8] sm:$0xff]  }
0x12bb   :  { %1349 = vrot.lane.b32.xlu0 %v1347_v58, %s2993_s4 }
0x12ca   :  { %v1344_v59 = vpop.permute.xlu1 %1343 }
0x12cb   :  { %v3448_v60 = vmul.f32 %v2812_v46, %v1344_v59 }
0x12cd   :  { %v1459_v61 = vpack.c.bf16 %v3448_v60, %v3448_v60 }
0x12cf   :  { %1461 = vrot.lane.b32.xlu1 %v1459_v61, %s2993_s4  ;;  %v1655_v61 = vmax.f32 %v3219_v2, 0.0 }
0x132d   :  { %v1350_v62 = vpop.permute.xlu0 %1349 }
0x132e   :  { %2544 = vmatmul.mubr.msk.bf16.vlgmr.msra.gmra.mrb[24].mxu1 %vm262_vm2, %v1350_v62 }
0x132f   :  { %2548 = vmatpush3.bf16.msra.mxu1 %v3161_v24  ;;  %2551 = vmatprep.mubr.msk.bf16.mxu1 %vm2991_vm1, %v2990_v25 }
0x1330   :  { %2549 = vmatprep.subr.bf16.mxu1 %v2990_v25 }
0x1333   :  { %2550 = vmatpush3.bf16.msra.mxu1 %v3175_v27  ;;  %v223_v27 = vcombine.high %v3146_v13, %v3146_v13 }
0x1334   :  { %2555 = vmatprep.subr.bf16.mxu1 %v2990_v25 }
0x1336   :  { %2552 = vmatmul.mubr.msk.bf16.vlgmr.msra.gmra.mrb[28].mxu1 %vm262_vm2, %v1350_v62 }
0x1337   :  { %2556 = vmatpush3.bf16.msra.mxu1 %v3229_v7  ;;  %2559 = vmatprep.mubr.msk.bf16.mxu1 %vm2991_vm1, %v2990_v25 }
0x1338   :  { %2557 = vmatprep.subr.bf16.mxu1 %v2990_v25 }
0x133b   :  { %2558 = vmatpush3.bf16.msra.mxu1 %v3237_v10 }
0x133c   :  { %2579 = vmatprep.subr.bf16.mxu1 %v2990_v25 }
0x1341   :  { %v1462_v24 = vpop.permute.xlu1 %1461 }
0x1342   :  { %2560 = vmatmul.mubr.msk.bf16.vlgmr.msra.gmra.mrb[28].mxu1 %vm262_vm2, %v1462_v24  ;;  %v1656_v24 = vpack.c.bf16 %v1655_v61, %v1655_v61 }
0x1343   :  { %2583 = vmatprep.mubr.msk.bf16.mxu1 %vm2991_vm1, %v2990_v25 }
0x1401   :  { %v1388_v63 = vpop.f32.mrb[24].mxu1 }
0x1402   :  { %v1394_v0 = vadd.f32 %v1388_v63, %v223_v27  ;;  %v2545_v1 = vpop.f32.mrb[25].mxu1  ;;  %v1775_v27 = vmax.f32 %v3318_v45, 0.0  ;;  %v1724_v45 = vmax.f32 %v3274_v57, 0.0 }
0x1403   :  { %v1391_v3 = vpop.f32.mrb[26].mxu1 }
0x1404   :  { %2817 = vtanh.f32 %v1394_v0  ;;  %v2546_v4 = vpop.f32.mrb[27].mxu1  ;;  %v2279_v13 = vmul.f32 -1.442695, %v1394_v0  ;;  %v1776_v63 = vpack.c.bf16 %v1775_v27, %v1775_v27  ;;  %v1877_v0 = vmax.f32 %v3405_v14, 0.0 }
0x1406   :  { %v1878_v1 = vpack.c.bf16 %v1877_v0, %v1877_v0 }
0x140e   :  { %v2818_v5 = vpop.eup %2817 }
0x140f   :  { %1404 = vrot.lane.b32.xlu0 %v2818_v5, %s2986_s10 }
0x1415   :  { %v1500_v6 = vpop.f32.mrb[28].mxu1 }
0x1416   :  { %v2656_v8 = vadd.f32 %v3207_v33, %v1500_v6  ;;  %v2561_v11 = vpop.f32.mrb[29].mxu1 }
0x1417   :  { %v1503_v12 = vpop.f32.mrb[30].mxu1 }
0x1418   :  { %2819 = vtanh.f32 %v2656_v8  ;;  %v2562_v15 = vpop.f32.mrb[31].mxu1  ;;  %v2282_v19 = vmul.f32 -1.442695, %v2656_v8  ;;  %v1725_v12 = vpack.c.bf16 %v1724_v45, %v1724_v45 }
0x1419   :  { %2821 = vpow2.f32 %v2279_v13  ;;  %v1826_v15 = vmax.f32 %v3361_v32, 0.0 }
0x141b   :  { %v1827_v57 = vpack.c.bf16 %v1826_v15, %v1826_v15 }
0x1422   :  { %v2820_v16 = vpop.eup %2819 }
0x1423   :  { %1516 = vrot.lane.b32.xlu1 %v2820_v16, %s2986_s10  ;;  %v2822_v17 = vpop.eup %2821  ;;  %v1928_v16 = vmax.f32 %v3448_v60, 0.0 }
0x1424   :  { %v1398_v18 = vadd.f32 1.0, %v2822_v17 }
0x1425   :  { %v1929_v32 = vpack.c.bf16 %v1928_v16, %v1928_v16 }
0x1426   :  { %2823 = vrcp.f32 %v1398_v18 }
0x1427   :  { %2825 = vpow2.f32 %v2282_v19 }
0x1430   :  { %v2824_v20 = vpop.eup %2823 }
0x1431   :  { %v2826_v28 = vpop.eup %2825  ;;  %v1402_v35 = vmul.f32 %v2824_v20, %v3438_v49 }
0x1432   :  { %v1510_v29 = vadd.f32 1.0, %v2826_v28 }
0x1434   :  { %2827 = vrcp.f32 %v1510_v29 }
0x143e   :  { %v2828_v30 = vpop.eup %2827 }
0x143f   :  { %v1514_v39 = vmul.f32 %v2828_v30, %v3443_v53 }
0x1481   :  { %v1405_v21 = vpop.permute.xlu0 %1404 }
0x1482   :  { %v1407_v22 = vmul.f32 %v2824_v20, %v1405_v21 }
0x1484   :  { %1409 = vrot.lane.b32.xlu0 %v1407_v22, %s2993_s4 }
0x1495   :  { %v1517_v31 = vpop.permute.xlu1 %1516 }
0x1496   :  { %v1519_v34 = vmul.f32 %v2828_v30, %v1517_v31 }
0x1498   :  { %1521 = vrot.lane.b32.xlu1 %v1519_v34, %s2993_s4 }
0x14f6   :  { %v1410_v36 = vpop.permute.xlu0 %1409 }
0x14f7   :  { %v1412_v37 = vadd.f32 %v1410_v36, %v1402_v35 }
0x14f9   :  { %2829 = vtanh.f32 %v1412_v37 }
0x1503   :  { %v2830_v38 = vpop.eup %2829 }
0x1504   :  { %1415 = vrot.lane.b32.xlu0 %v2830_v38, %s2986_s10 }
0x150a   :  { %v1522_v40 = vpop.permute.xlu1 %1521 }
0x150b   :  { %v1524_v41 = vadd.f32 %v1522_v40, %v1514_v39 }
0x150d   :  { %2831 = vtanh.f32 %v1524_v41 }
0x1517   :  { %v2832_v42 = vpop.eup %2831 }
0x1518   :  { %1527 = vrot.lane.b32.xlu1 %v2832_v42, %s2986_s10 }
0x1576   :  { %v1416_v43 = vpop.permute.xlu0 %1415 }
0x1577   :  { %v1418_v23 = vmul.f32 %v2824_v20, %v1416_v43 }
0x1579   :  { %v1531_v44 = vpack.c.bf16 %v1418_v23, %v1418_v23 }
0x157b   :  { %1533 = vrot.lane.b32.xlu0 %v1531_v44, %s2993_s4 }
0x158a   :  { %v1528_v46 = vpop.permute.xlu1 %1527 }
0x158b   :  { %v1530_v47 = vmul.f32 %v2828_v30, %v1528_v46 }
0x158d   :  { %v1578_v26 = vpack.c.bf16 %v1530_v47, %v1530_v47  ;;  %v1979_v3 = vmax.f32 %v1530_v47, 0.0 }
0x158f   :  { %1580 = vrot.lane.b32.xlu1 %v1578_v26, %s2993_s4  ;;  %v1980_v4 = vpack.c.bf16 %v1979_v3, %v1979_v3  ;;  %v2286_v26 = vld [vmem:[#allocation5] ss:$0 sm:$0xff] }
0x15ed   :  { %v1534_v48 = vpop.permute.xlu0 %1533 }
0x15ee   :  { %2568 = vmatmul.mubr.msk.bf16.vlgmr.msra.gmra.mrb[28].mxu0 %vm262_vm2, %v1534_v48 }
0x15ef   :  { %2572 = vmatpush3.bf16.msra.mxu0 %v3229_v7  ;;  %2575 = vmatprep.mubr.msk.bf16.mxu0 %vm2991_vm1, %v2990_v25 }
0x15f0   :  { %2573 = vmatprep.subr.bf16.mxu0 %v2990_v25 }
0x15f3   :  { %2574 = vmatpush3.bf16.msra.mxu0 %v3237_v10  ;;  %v3498_v10 = vld [vmem:[%s3631_s7] sm:$0xff]  }
0x15f4   :  { %2587 = vmatprep.subr.bf16.mxu0 %v2990_v25  ;;  %2580 = vmatpush3.bf16.msra.mxu1 %v3498_v10 }
0x15f5   :  { %2581 = vmatprep.subr.bf16.mxu1 %v2990_v25 }
0x15f8   :  { %2582 = vmatpush3.bf16.msra.mxu1 %v3507_v56 }
0x15f9   :  { %2595 = vmatprep.subr.bf16.mxu1 %v2990_v25 }
0x1601   :  { %v1581_v9 = vpop.permute.xlu1 %1580 }
0x1602   :  { %2576 = vmatmul.mubr.msk.bf16.vlgmr.msra.gmra.mrb[28].mxu0 %vm262_vm2, %v1581_v9 }
0x1603   :  { %2591 = vmatprep.mubr.msk.bf16.mxu0 %vm2991_vm1, %v2990_v25  ;;  %2588 = vmatpush3.bf16.msra.mxu0 %v3498_v10 }
0x1604   :  { %2589 = vmatprep.subr.bf16.mxu0 %v2990_v25 }
0x1607   :  { %2590 = vmatpush3.bf16.msra.mxu0 %v3507_v56 }
0x1608   :  { %2603 = vmatprep.subr.bf16.mxu0 %v2990_v25 }
0x16d5   :  { %v1619_v49 = vpop.f32.mrb[28].mxu0 }
0x16d6   :  { %v2657_v50 = vadd.f32 %v3207_v33, %v1619_v49  ;;  %v2577_v51 = vpop.f32.mrb[29].mxu0 }
0x16d7   :  { %v1622_v7 = vpop.f32.mrb[30].mxu0 }
0x16d8   :  { %2833 = vtanh.f32 %v2657_v50  ;;  %v2578_v52 = vpop.f32.mrb[31].mxu0  ;;  %v2285_v33 = vmul.f32 -1.442695, %v2657_v50 }
0x16da   :  { %2835 = vpow2.f32 %v2285_v33 }
0x16e2   :  { %v2834_v53 = vpop.eup %2833 }
0x16e3   :  { %1635 = vrot.lane.b32.xlu0 %v2834_v53, %s2986_s10 }
0x16e4   :  { %v2836_v54 = vpop.eup %2835 }
0x16e5   :  { %v1629_v55 = vadd.f32 1.0, %v2836_v54 }
0x16e7   :  { %2837 = vrcp.f32 %v1629_v55 }
0x16f1   :  { %v2838_v58 = vpop.eup %2837 }
0x16f2   :  { %v1633_v2 = vmul.f32 %v2838_v58, %v1524_v41 }
0x1755   :  { %v1636_v59 = vpop.permute.xlu0 %1635 }
0x1756   :  { %v1638_v62 = vmul.f32 %v2838_v58, %v1636_v59 }
0x1758   :  { %1640 = vrot.lane.b32.xlu1 %v1638_v62, %s2993_s4 }
0x175c   :  { %1664 = vrot.lane.b32.xlu1 %v1656_v24, %s2993_s4 }
0x1760   :  { %1778 = vrot.lane.b32.xlu1 %v1776_v63, %s2993_s4 }
0x1764   :  { %1880 = vrot.lane.b32.xlu1 %v1878_v1, %s2993_s4 }
0x1768   :  { %1982 = vrot.lane.b32.xlu1 %v1980_v4, %s2993_s4 }
0x17ca   :  { %v1641_v5 = vpop.permute.xlu1 %1640 }
0x17cb   :  { %v1643_v6 = vadd.f32 %v1641_v5, %v1633_v2 }
0x17cd   :  { %2839 = vtanh.f32 %v1643_v6 }
0x17ce   :  { %v1665_v8 = vpop.permute.xlu1 %1664 }
0x17cf   :  { %2584 = vmatmul.mubr.msk.bf16.vlgmr.msra.gmra.mrb[32].mxu1 %vm262_vm2, %v1665_v8 }
0x17d0   :  { %2596 = vmatpush3.bf16.msra.mxu1 %v3498_v10  ;;  %2599 = vmatprep.mubr.msk.bf16.mxu1 %vm2991_vm1, %v2990_v25 }
0x17d1   :  { %2597 = vmatprep.subr.bf16.mxu1 %v2990_v25 }
0x17d2   :  { %v1779_v14 = vpop.permute.xlu1 %1778 }
0x17d4   :  { %2598 = vmatpush3.bf16.msra.mxu1 %v3507_v56 }
0x17d5   :  { %2611 = vmatprep.subr.bf16.mxu1 %v2990_v25 }
0x17d6   :  { %v1881_v13 = vpop.permute.xlu1 %1880 }
0x17d7   :  { %v2840_v11 = vpop.eup %2839  ;;  %2600 = vmatmul.mubr.msk.bf16.vlgmr.msra.gmra.mrb[36].mxu1 %vm262_vm2, %v1779_v14 }
0x17d8   :  { %2612 = vmatpush3.bf16.msra.mxu1 %v3498_v10  ;;  %1646 = vrot.lane.b32.xlu0 %v2840_v11, %s2986_s10 }
0x17d9   :  { %2613 = vmatprep.subr.bf16.mxu1 %v2990_v25  ;;  %2615 = vmatprep.mubr.msk.bf16.mxu1 %vm2991_vm1, %v2990_v25 }
0x17da   :  { %v1983_v60 = vpop.permute.xlu1 %1982 }
0x17dc   :  { %2614 = vmatpush3.bf16.msra.mxu1 %v3507_v56  ;;  %1727 = vrot.lane.b32.xlu0 %v1725_v12, %s2993_s4 }
0x17dd   :  { %2627 = vmatprep.subr.bf16.mxu1 %v2990_v25 }
0x17df   :  { %2616 = vmatmul.mubr.msk.bf16.vlgmr.msra.gmra.mrb[40].mxu1 %vm262_vm2, %v1881_v13 }
0x17e0   :  { %2628 = vmatpush3.bf16.msra.mxu1 %v3498_v10  ;;  %1829 = vrot.lane.b32.xlu0 %v1827_v57, %s2993_s4 }
0x17e1   :  { %2629 = vmatprep.subr.bf16.mxu1 %v2990_v25  ;;  %2631 = vmatprep.mubr.msk.bf16.mxu1 %vm2991_vm1, %v2990_v25 }
0x17e4   :  { %2630 = vmatpush3.bf16.msra.mxu1 %v3507_v56  ;;  %1931 = vrot.lane.b32.xlu0 %v1929_v32, %s2993_s4 }
0x17e5   :  { %2643 = vmatprep.subr.bf16.mxu1 %v2990_v25 }
0x17e7   :  { %2632 = vmatmul.mubr.msk.bf16.vlgmr.msra.gmra.mrb[44].mxu1 %vm262_vm2, %v1983_v60 }
0x17e8   :  { %2647 = vmatprep.mubr.msk.bf16.mxu1 %vm2991_vm1, %v2990_v25 }
0x184a   :  { %v1647_v17 = vpop.permute.xlu0 %1646 }
0x184b   :  { %v1649_v18 = vmul.f32 %v2838_v58, %v1647_v17  ;;  %v2711_v17 = vld [vmem:[%s3635_s11] sm:$0xff]  }
0x184c   :  { %2644 = vmatpush3.bf16.msra.mxu1 %v2711_v17 }
0x184d   :  { %v2030_v19 = vmax.f32 %v1649_v18, 0.0  ;;  %2645 = vmatprep.subr.bf16.mxu1 %v2990_v25  ;;  %v2712_v18 = vld [vmem:[%s3635_s11 + $0x8] sm:$0xff]   ;;  %s2994_s11 = smov [#allocation11]  }
0x184e   :  { %v1728_v20 = vpop.permute.xlu0 %1727  ;;  %s2226_s8 = sshll.u32 %s2994_s11, 4  ;;  %s2227_s8 = int_to_ptr.vmem [resolvable:$true] %s2226_s8 }
0x184f   :  { %v2031_v21 = vpack.c.bf16 %v2030_v19, %v2030_v19  ;;  %2592 = vmatmul.mubr.msk.bf16.vlgmr.msra.gmra.mrb[32].mxu0 %vm262_vm2, %v1728_v20  ;;  %s2953_s1 = scalar_lea.vmem %s2227_s8, 64  ;;  %p2958_p13 = scmp.lt.s32.totalorder %s2227_s8, %s2227_s8 }
0x1850   :  { %2604 = vmatpush3.bf16.msra.mxu0 %v3498_v10  ;;  %2607 = vmatprep.mubr.msk.bf16.mxu0 %vm2991_vm1, %v2990_v25  ;;  %p2954_p12 = scmp.ne.s32.totalorder %s2227_s8, %s2953_s1  ;;  %p2959_p0 = scmp.lt.s32.totalorder %s2953_s1, %s2953_s1 }
0x1851   :  { %2033 = vrot.lane.b32.xlu0 %v2031_v21, %s2993_s4  ;;  %2605 = vmatprep.subr.bf16.mxu0 %v2990_v25 }
0x1852   :  { %v1830_v22 = vpop.permute.xlu0 %1829  ;;  %2646 = vmatpush3.bf16.msra.mxu1 %v2712_v18  ;;  %p2960_p1 = por %p2959_p0, %p2958_p13 }
0x1854   :  { %2606 = vmatpush3.bf16.msra.mxu0 %v3507_v56  ;;  %p2961_p2 = pnand %p2960_p1, %p2954_p12 }
0x1855   :  { %2619 = vmatprep.subr.bf16.mxu0 %v2990_v25 }
0x1856   :  { %v1932_v28 = vpop.permute.xlu0 %1931 }
0x1857   :  { %2608 = vmatmul.mubr.msk.bf16.vlgmr.msra.gmra.mrb[36].mxu0 %vm262_vm2, %v1830_v22 }
0x1858   :  { %2620 = vmatpush3.bf16.msra.mxu0 %v3498_v10  ;;  %2623 = vmatprep.mubr.msk.bf16.mxu0 %vm2991_vm1, %v2990_v25 }
0x1859   :  { %2621 = vmatprep.subr.bf16.mxu0 %v2990_v25 }
0x185c   :  { %2622 = vmatpush3.bf16.msra.mxu0 %v3507_v56 }
0x185d   :  { %2635 = vmatprep.subr.bf16.mxu0 %v2990_v25 }
0x185f   :  { %2624 = vmatmul.mubr.msk.bf16.vlgmr.msra.gmra.mrb[40].mxu0 %vm262_vm2, %v1932_v28 }
0x1860   :  { %2636 = vmatpush3.bf16.msra.mxu0 %v3498_v10  ;;  %2639 = vmatprep.mubr.msk.bf16.mxu0 %vm2991_vm1, %v2990_v25 }
0x1861   :  { %2637 = vmatprep.subr.bf16.mxu0 %v2990_v25 }
0x1864   :  { %2638 = vmatpush3.bf16.msra.mxu0 %v3507_v56 }
0x18a2   :  { %v1715_v29 = vpop.f32.mrb[32].mxu1 }
0x18a3   :  { %v2585_v30 = vpop.f32.mrb[33].mxu1  ;;  %v3574_v48 = vadd.f32 %v2286_v26, %v1715_v29 }
0x18a4   :  { %v1718_v31 = vpop.f32.mrb[34].mxu1 }
0x18a5   :  { %v2586_v34 = vpop.f32.mrb[35].mxu1  ;;  %v1722_v52 = vmul.f32 %v3574_v48, %v3574_v48 }
0x18aa   :  { %v1817_v35 = vpop.f32.mrb[36].mxu1 }
0x18ab   :  { %v2601_v36 = vpop.f32.mrb[37].mxu1  ;;  %v3576_v49 = vadd.f32 %v2286_v26, %v1817_v35 }
0x18ac   :  { %v1820_v37 = vpop.f32.mrb[38].mxu1 }
0x18ad   :  { %v2602_v38 = vpop.f32.mrb[39].mxu1  ;;  %v1824_v54 = vmul.f32 %v3576_v49, %v3576_v49 }
0x18b2   :  { %v1919_v39 = vpop.f32.mrb[40].mxu1 }
0x18b3   :  { %v2617_v40 = vpop.f32.mrb[41].mxu1  ;;  %v3589_v61 = vadd.f32 %v2286_v26, %v1919_v39 }
0x18b4   :  { %v1922_v41 = vpop.f32.mrb[42].mxu1 }
0x18b5   :  { %v2618_v42 = vpop.f32.mrb[43].mxu1  ;;  %v1926_v3 = vmul.f32 %v3589_v61, %v3589_v61 }
0x18ba   :  { %v2021_v43 = vpop.f32.mrb[44].mxu1 }
0x18bb   :  { %v2633_v23 = vpop.f32.mrb[45].mxu1  ;;  %v2022_v8 = vadd.f32 %v2286_v26, %v2021_v43 }
0x18bc   :  { %v2024_v44 = vpop.f32.mrb[46].mxu1 }
0x18bd   :  { %v2634_v46 = vpop.f32.mrb[47].mxu1  ;;  %v2028_v16 = vmul.f32 %v2022_v8, %v2022_v8 }
0x18c3   :  { %v2034_v47 = vpop.permute.xlu0 %2033 }
0x18c4   :  { %2640 = vmatmul.mubr.msk.bf16.vlgmr.msra.gmra.mrb[44].mxu0 %vm262_vm2, %v2034_v47 }
0x1922   :  { %v1766_v9 = vpop.f32.mrb[32].mxu0 }
0x1923   :  { %v3578_v50 = vadd.f32 %v2286_v26, %v1766_v9  ;;  %v2593_v51 = vpop.f32.mrb[33].mxu0 }
0x1924   :  { %v1769_v7 = vpop.f32.mrb[34].mxu0 }
0x1925   :  { %v1772_v53 = vadd.f32 %v3578_v50, %v3574_v48  ;;  %v1773_v10 = vmul.f32 %v3578_v50, %v3578_v50  ;;  %v2594_v33 = vpop.f32.mrb[35].mxu0 }
0x1927   :  { %v1774_v55 = vadd.f32 %v1773_v10, %v1722_v52  ;;  %v1823_v56 = vadd.f32 %v3576_v49, %v1772_v53  ;;  %v2108_v52 = vlaneseq  ;;  %v2100_v10 = vld [vmem:[#allocation7] sm:$0x1] }
0x1929   :  { %v1825_v58 = vadd.f32 %v1824_v54, %v1774_v55  ;;  %v2109_v53 = vshrl.u32 %v2108_v52, 7 }
0x192a   :  { %v1868_v59 = vpop.f32.mrb[36].mxu0 }
0x192b   :  { %v3591_v62 = vadd.f32 %v2286_v26, %v1868_v59  ;;  %v2609_v24 = vpop.f32.mrb[37].mxu0  ;;  %v2110_v33 = vsub.s32 0, %v2109_v53 }
0x192c   :  { %v1871_v27 = vpop.f32.mrb[38].mxu0 }
0x192d   :  { %v1874_v63 = vadd.f32 %v3591_v62, %v1823_v56  ;;  %v1875_v0 = vmul.f32 %v3591_v62, %v3591_v62  ;;  %v2610_v1 = vpop.f32.mrb[39].mxu0  ;;  %v2104_v56 = vld [vmem:[#allocation8] sm:$0x1] }
0x192f   :  { %v1876_v4 = vadd.f32 %v1875_v0, %v1825_v58  ;;  %v1925_v2 = vadd.f32 %v3589_v61, %v1874_v63 }
0x1931   :  { %v1927_v5 = vadd.f32 %v1926_v3, %v1876_v4 }
0x1932   :  { %v1970_v6 = vpop.f32.mrb[40].mxu0 }
0x1933   :  { %v1971_v45 = vadd.f32 %v2286_v26, %v1970_v6  ;;  %v2625_v14 = vpop.f32.mrb[41].mxu0 }
0x1934   :  { %v1973_v11 = vpop.f32.mrb[42].mxu0 }
0x1935   :  { %v1976_v12 = vadd.f32 %v1971_v45, %v1925_v2  ;;  %v1977_v15 = vmul.f32 %v1971_v45, %v1971_v45  ;;  %v2626_v57 = vpop.f32.mrb[43].mxu0 }
0x1937   :  { %v1978_v13 = vadd.f32 %v1977_v15, %v1927_v5  ;;  %v2027_v32 = vadd.f32 %v2022_v8, %v1976_v12 }
0x1939   :  { %v2029_v60 = vadd.f32 %v2028_v16, %v1978_v13 }
0x1997   :  { %v2072_v19 = vpop.f32.mrb[44].mxu0 }
0x1998   :  { %v2073_v20 = vadd.f32 %v2286_v26, %v2072_v19  ;;  %v2641_v21 = vpop.f32.mrb[45].mxu0 }
0x1999   :  { %v2075_v22 = vpop.f32.mrb[46].mxu0 }
0x199a   :  { %v2078_v28 = vadd.f32 %v2073_v20, %v2027_v32  ;;  %v2079_v29 = vmul.f32 %v2073_v20, %v2073_v20  ;;  %v2642_v30 = vpop.f32.mrb[47].mxu0 }
0x199c   :  { %v2080_v31 = vadd.f32 %v2079_v29, %v2029_v60  ;;  %v2082_v34 = vsel %vm2081_vm3, %v2078_v28, 0.0 }
0x199d   :  { %v2083_v35 = vrot.slane %v2082_v34, 4 }
0x199e   :  { %v2090_v36 = vsel %vm2081_vm3, %v2080_v31, 0.0  ;;  %v2297_v31 = vld [vmem:[#allocation10] ss:$0 sm:$0xff] }
0x199f   :  { %v2084_v37 = vadd.f32 %v2083_v35, %v2082_v34  ;;  %v2091_v38 = vrot.slane %v2090_v36, 4 }
0x19a1   :  { %v2085_v25 = vrot.slane %v2084_v37, 2  ;;  %v2092_v39 = vadd.f32 %v2091_v38, %v2090_v36 }
0x19a3   :  { %v2086_v40 = vadd.f32 %v2085_v25, %v2084_v37  ;;  %v2093_v41 = vrot.slane %v2092_v39, 2 }
0x19a5   :  { %v2087_v42 = vrot.slane %v2086_v40, 1  ;;  %v2094_v43 = vadd.f32 %v2093_v41, %v2092_v39 }
0x19a7   :  { %v2088_v23 = vadd.f32 %v2087_v42, %v2086_v40  ;;  %v2095_v44 = vrot.slane %v2094_v43, 1 }
0x19a9   :  { %v2089_v46 = vmul.f32 0.03125, %v2088_v23  ;;  %v2096_v47 = vadd.f32 %v2095_v44, %v2094_v43 }
0x19ab   :  { %v2097_v26 = vmul.f32 0.03125, %v2096_v47  ;;  %v2098_v9 = vmul.f32 %v2089_v46, %v2089_v46 }
0x19ad   :  { %v2099_v51 = vsub.f32 %v2097_v26, %v2098_v9 }
0x19af   :  { %v2101_v7 = vadd.f32 1e-05, %v2099_v51 }
0x19b1   :  { %2841 = vrsqrt.f32 %v2101_v7 }
0x19bb   :  { %v2842_v54 = vpop.eup %2841 }
0x19bc   :  { %v2103_v55 = vmul.f32 %v2842_v54, %v2100_v10 }
0x19be   :  { %v2105_v58 = vmul.f32 %v2103_v55, %v2089_v46  ;;  %v2111_v59 = vrot.slane %v2103_v55, %v2110_v33 }
0x19c0   :  { %v2106_v24 = vsub.f32 %v2104_v56, %v2105_v58  ;;  %v2113_v27 = vmul.f32 %v2111_v59, %v3574_v48  ;;  %v2123_v63 = vmul.f32 %v2111_v59, %v3578_v50  ;;  %v2127_v0 = vmul.f32 %v2111_v59, %v3576_v49 }
0x19c1   :  { %v2131_v1 = vmul.f32 %v2111_v59, %v3591_v62  ;;  %v2135_v3 = vmul.f32 %v2111_v59, %v3589_v61  ;;  %v2139_v4 = vmul.f32 %v2111_v59, %v1971_v45  ;;  %v2143_v2 = vmul.f32 %v2111_v59, %v2022_v8 }
0x19c2   :  { %v2118_v5 = vrot.slane %v2106_v24, %v2110_v33  ;;  %v2147_v6 = vmul.f32 %v2111_v59, %v2073_v20 }
0x19c4   :  { %v2120_v14 = vadd.f32 %v2118_v5, %v2113_v27  ;;  %v2124_v11 = vadd.f32 %v2123_v63, %v2118_v5  ;;  %v2128_v12 = vadd.f32 %v2127_v0, %v2118_v5  ;;  %v2132_v15 = vadd.f32 %v2131_v1, %v2118_v5 }
0x19c5   :  { %v2136_v57 = vadd.f32 %v2135_v3, %v2118_v5  ;;  %v2140_v16 = vadd.f32 %v2139_v4, %v2118_v5  ;;  %v2144_v13 = vadd.f32 %v2143_v2, %v2118_v5  ;;  %v2148_v48 = vadd.f32 %v2147_v6, %v2118_v5 }
0x19c6   :  { %v2121_v32 = vmax.f32 %v2120_v14, 0.0  ;;  %v2125_v50 = vmax.f32 %v2124_v11, 0.0  ;;  %v2129_v49 = vmax.f32 %v2128_v12, 0.0  ;;  %v2133_v62 = vmax.f32 %v2132_v15, 0.0 }
0x19c7   :  { %v2137_v61 = vmax.f32 %v2136_v57, 0.0  ;;  %v2141_v8 = vmax.f32 %v2140_v16, 0.0  ;;  %v2145_v20 = vmax.f32 %v2144_v13, 0.0  ;;  %v2149_v22 = vmax.f32 %v2148_v48, 0.0 }
0x19c8   :  { %v2126_v60 = vadd.f32 %v2125_v50, %v2121_v32 }
0x19ca   :  { %v2130_v17 = vadd.f32 %v2129_v49, %v2126_v60 }
0x19cc   :  { %v2134_v18 = vadd.f32 %v2133_v62, %v2130_v17 }
0x19ce   :  { %v2138_v45 = vadd.f32 %v2137_v61, %v2134_v18 }
0x19d0   :  { %v2142_v19 = vadd.f32 %v2141_v8, %v2138_v45 }
0x19d2   :  { %v2146_v21 = vadd.f32 %v2145_v20, %v2142_v19 }
0x19d4   :  { %v2150_v28 = vadd.f32 %v2149_v22, %v2146_v21 }
0x19d6   :  { %v2151_v29 = vmul.f32 0.125, %v2150_v28 }
0x19d8   :  { %v2152_v30 = vpack.c.bf16 %v2151_v29, %v2151_v29 }
0x19da   :  { %2648 = vmatmul.mubr.msk.bf16.vlgmr.msra.gmra.mrb[48].mxu1 %vm262_vm2, %v2152_v30 }
0x1aad   :  { %v2213_v34 = vpop.f32.mrb[48].mxu1 }
0x1aae   :  { %v2214_v35 = vadd.f32 %v2297_v31, %v2213_v34  ;;  %v2649_v36 = vpop.f32.mrb[49].mxu1 }
0x1aaf   :  { %v2216_v37 = vpop.f32.mrb[50].mxu1 }
0x1ab0   :  { %2219 = vst [vmem:[#allocation11] sm:$0xf] %v2214_v35  ;;  %v2650_v38 = vpop.f32.mrb[51].mxu1 }
0x1ab1   :  { %2964 = shalt.err (!%p2961_p2)
}
0x1ab2   :  { %s2965_s25 = scalar_lea.hbm %s3637_s13, 64 }
0x1ab3   :  { %p2966_p3 = scmp.ne.s32.totalorder %s3637_s13, %s2965_s25  ;;  %p2969_p4 = scmp.lt.u32.totalorder %s2965_s25, %s3637_s13 }
0x1ab5   :  { %p2971_p5 = pnand %p2969_p4, %p2966_p3 }
0x1ab7   :  { %2974 = shalt.err (!%p2971_p5)
}
0x1ab8   :  { %2229 = dma.vmem_to_hbm [thread:$0]  %s2227_s8, 64, %s3637_s13, [#allocation4]  }
0x1ab9   :  { %2981 = dma.done.wait [#allocation4], 64  }
0x1aba   :  { %2982 = vsyncadd [#allocation4], 4294967232 }
0x1abb   :  { %2233 = vsyncpa [#allocation3], 1 }
0x1abc   :  { %2234 = vsyncpa [#allocation6], 1 }
0x1abd   :  { %2235 = vsyncpa [#allocation9], 1 }
0x1abe   :  { %2236 = vsyncpa [#allocation4], 1 }

</bundles_post_ra>
